<compile_context>
chip_gen: v5e
topology: v5e:2x2
jax: 0.10.0
libtpu: 0.0.40
codegen_flags: <defaults>
</compile_context>

<pallas_src>
import jax
import jax.numpy as jnp
from jax.experimental import pallas as pl
from jax.experimental.pallas import tpu as pltpu


# --------------------------- helper matrices -------------------------------- #

def _adaptive_avg_matrix(in_len, out_len):
    """Row j averages window [floor(j*I/O), ceil((j+1)*I/O)) — PyTorch AdaptiveAvgPool."""
    j = jnp.arange(out_len)
    start = (j * in_len) // out_len
    end = ((j + 1) * in_len + out_len - 1) // out_len
    idx = jnp.arange(in_len)[None, :]
    mask = (idx >= start[:, None]) & (idx < end[:, None])
    return mask.astype(jnp.float32) / (end - start)[:, None].astype(jnp.float32)


# ------------------------------ parameters ---------------------------------- #

def init_params(key, in_ch=22, num_classes=2):
    ks = jax.random.split(key, 8)

    def u(k, shape, fan_in):
        b = 1.0 / (fan_in ** 0.5)
        return jax.random.uniform(k, shape, jnp.float32, -b, b)

    return dict(
        conv1_w=u(ks[0], (32, in_ch, 3), in_ch * 3),
        conv1_b=u(ks[1], (32,), in_ch * 3),
        conv2_w=u(ks[2], (64, 32, 3), 32 * 3),
        conv2_b=u(ks[3], (64,), 32 * 3),
        fc1_w=u(ks[4], (256, 1024), 1024),
        fc1_b=u(ks[5], (256,), 1024),
        fc2_w=u(ks[6], (num_classes, 256), 256),
        fc2_b=u(ks[7], (num_classes,), 256),
    )


# ------------------------------- forward ------------------------------------ #

def eeg1d_convnet(x, params, block_b=128):
    B, C_in, L = x.shape
    L1 = (L - 3) // 2 + 1      # conv1: k=3, stride=2, no padding
    L2 = (L1 - 3) // 3 + 1     # pool1: k=3, stride=3 (floor mode)
    L3 = (L2 - 3) // 2 + 1     # conv2: k=3, stride=2
    L4 = (L3 - 3) // 3 + 1     # pool2: k=3, stride=3
    assert L4 >= 1, "input length too short for this network"
    NC = params["fc2_w"].shape[0]

    # Batch tile: multiple of 16 so every (T, Bblk, C) <-> (T*Bblk, C) reshape in
    # the kernel is a layout-trivial leading-dim merge/split (bf16 & f32).
    Bblk = max(16, min(block_b, B))
    Bblk = ((Bblk + 15) // 16) * 16
    nb = pl.cdiv(B, Bblk)
    Bp = nb * Bblk

    # ---- host-side layout plumbing: time-major + conv1 im2col, bf16 input ----
    x_t = jnp.transpose(x, (2, 0, 1))                              # (L, B, C_in)
    if Bp != B:
        x_t = jnp.pad(x_t, ((0, 0), (0, Bp - B), (0, 0)))
    taps = [x_t[k:k + 2 * L1 - 1:2] for k in range(3)]             # 3 x (L1, Bp, C_in)
    x_col = jnp.concatenate(taps, axis=-1).astype(jnp.bfloat16)    # (L1, Bp, 3*C_in)

    # Conv weights stacked along the contraction axis (tap-major, channel-minor).
    w1 = jnp.transpose(params["conv1_w"], (2, 1, 0)).reshape(3 * C_in, 32).astype(jnp.bfloat16)
    b1 = params["conv1_b"].reshape(1, 32).astype(jnp.float32)
    w2 = jnp.transpose(params["conv2_w"], (2, 1, 0)).astype(jnp.bfloat16)   # (3, 32, 64)
    b2 = params["conv2_b"].reshape(1, 64).astype(jnp.float32)

    # Fold AdaptiveAvgPool2d((32,32)) + flatten into fc1:
    #   wf1[q*64 + p, n] = sum_{i,j} fc1_w[n, 32*i + j] * A_h[i, p] * A_w[j, q]
    a_h = _adaptive_avg_matrix(64, 32)                              # (32, 64)   pooled-ch <- raw ch
    a_w = _adaptive_avg_matrix(L4, 32)                              # (32, L4)   pooled-t  <- raw t
    w1r = params["fc1_w"].reshape(256, 32, 32)                      # [n, i, j]
    wf1 = jnp.einsum("nij,ip,jq->qpn", w1r, a_h, a_w).reshape(L4 * 64, 256).astype(jnp.bfloat16)
    bf1 = params["fc1_b"].reshape(1, 256).astype(jnp.float32)
    wf2 = params["fc2_w"].T.astype(jnp.bfloat16)                    # (256, NC)
    bf2 = params["fc2_b"].reshape(1, NC).astype(jnp.float32)

    def kernel(xc_ref, w1_ref, b1_ref, w2_ref, b2_ref,
               wf1_ref, bf1_ref, wf2_ref, bf2_ref, out_ref, y1_s):
        # ---- conv1 (k=3, s=2): taps pre-stacked on K (host im2col) -> one
        # 2-D MXU matmul with M = L1*Bblk rows. ----
        col1 = xc_ref[...].reshape(L1 * Bblk, 3 * C_in)                       # bf16
        y1 = jnp.dot(col1, w1_ref[...], preferred_element_type=jnp.float32) + b1_ref[...]
        y1_s[...] = y1.reshape(L1, Bblk, 32)                                  # (L1, Bblk, 32) f32

        # ---- maxpool1 (k=3, s=3), emitted as even/odd pooled positions so the
        # stride-2 conv2 taps below are contiguous slices (no extra scratch). ----
        pe = jnp.maximum(
            jnp.maximum(y1_s[pl.ds(0, L3 + 1, stride=6), :, :],
                        y1_s[pl.ds(1, L3 + 1, stride=6), :, :]),
            y1_s[pl.ds(2, L3 + 1, stride=6), :, :])          # (L3+1, Bblk, 32) = pool1[0::2]
        po = jnp.maximum(
            jnp.maximum(y1_s[pl.ds(3, L3, stride=6), :, :],
                        y1_s[pl.ds(4, L3, stride=6), :, :]),
            y1_s[pl.ds(5, L3, stride=6), :, :])               # (L3,   Bblk, 32) = pool1[1::2]
        # TODO(synk): nn.Dropout(p=0.2) is identity here (inference-only forward).

        # ---- conv2 (k=3, s=2): three per-tap 2-D matmuls (M = L3*Bblk), f32 accum ----
        taps2 = (pe[0:L3], po, pe[1:L3 + 1])
        acc = None
        for k in range(3):
            lhs = taps2[k].astype(jnp.bfloat16).reshape(L3 * Bblk, 32)
            term = jnp.dot(lhs, w2_ref[k], preferred_element_type=jnp.float32)
            acc = term if acc is None else acc + term
        y2 = (acc + b2_ref[...]).reshape(L3, Bblk, 64)        # (L3, Bblk, 64) f32

        # ---- maxpool2 (k=3, s=3) + AdaptiveAvgPool2d + flatten + fc1 (folded)
        # as per-q matmuls against wf1 rows [q*64, (q+1)*64). ----
        h = None
        for q in range(L4):
            win = jnp.maximum(jnp.maximum(y2[3 * q], y2[3 * q + 1]), y2[3 * q + 2])  # (Bblk, 64)
            hq = jnp.dot(win.astype(jnp.bfloat16), wf1_ref[pl.ds(q * 64, 64), :],
                         preferred_element_type=jnp.float32)
            h = hq if h is None else h + hq
        h = jnp.maximum(h + bf1_ref[...], 0.0)                # ReLU, (Bblk, 256)

        # ---- fc2 + softmax(dim=1) ----
        logits = jnp.dot(h.astype(jnp.bfloat16), wf2_ref[...],
                         preferred_element_type=jnp.float32) + bf2_ref[...]
        m = jnp.max(logits, axis=-1, keepdims=True)
        e = jnp.exp(logits - m)
        out_ref[...] = e * pl.reciprocal(jnp.sum(e, axis=-1, keepdims=True), approx=True)

    def fullspec(a):
        n = a.ndim
        return pl.BlockSpec(a.shape, lambda b, n=n: (0,) * n)

    macs = Bp * (L1 * 3 * C_in * 32 + L3 * 3 * 32 * 64 + L4 * 64 * 256 + 256 * NC)
    cost = pl.CostEstimate(
        flops=int(2 * macs),
        transcendentals=int(Bp * NC),
        bytes_accessed=int(x_col.size * 2 + Bp * NC * 4
                           + 2 * (w1.size + w2.size + wf1.size + wf2.size)
                           + 4 * (b1.size + b2.size + bf1.size + bf2.size)),
    )

    out = pl.pallas_call(
        kernel,
        out_shape=jax.ShapeDtypeStruct((Bp, NC), jnp.float32),
        grid=(nb,),
        in_specs=[
            pl.BlockSpec((L1, Bblk, 3 * C_in), lambda b: (0, b, 0)),
            fullspec(w1), fullspec(b1), fullspec(w2), fullspec(b2),
            fullspec(wf1), fullspec(bf1), fullspec(wf2), fullspec(bf2),
        ],
        out_specs=pl.BlockSpec((Bblk, NC), lambda b: (b, 0)),
        scratch_shapes=[pltpu.VMEM((L1, Bblk, 32), jnp.float32)],   # conv1 output (strided pool reads)
        compiler_params=pltpu.CompilerParams(
            dimension_semantics=("parallel",),
            # v7x-safe scoped budget; on v5e/v6e block_b and this limit can be raised further.
            vmem_limit_bytes=48 * 1024 * 1024),
        cost_estimate=cost,
    )(x_col, w1, b1, w2, b2, wf1, bf1, wf2, bf2)

    return out[:B]


# --------------------------- pure-JAX reference ------------------------------ #

def reference_forward(x, params):
    y = jax.lax.conv_general_dilated(x, params["conv1_w"], (2,), "VALID",
                                     dimension_numbers=("NCH", "OIH", "NCH"))
    y = y + params["conv1_b"][None, :, None]
    y = jax.lax.reduce_window(y, -jnp.inf, jax.lax.max, (1, 1, 3), (1, 1, 3), "VALID")
    y = jax.lax.conv_general_dilated(y, params["conv2_w"], (2,), "VALID",
                                     dimension_numbers=("NCH", "OIH", "NCH"))
    y = y + params["conv2_b"][None, :, None]
    y = jax.lax.reduce_window(y, -jnp.inf, jax.lax.max, (1, 1, 3), (1, 1, 3), "VALID")
    a_h = _adaptive_avg_matrix(y.shape[1], 32)
    a_w = _adaptive_avg_matrix(y.shape[2], 32)
    p = jnp.einsum("bct,ic,jt->bij", y, a_h, a_w)
    z = p.reshape(y.shape[0], -1) @ params["fc1_w"].T + params["fc1_b"]
    z = jnp.maximum(z, 0.0)
    z = z @ params["fc2_w"].T + params["fc2_b"]
    return jax.nn.softmax(z, axis=1)


# -------------------------------- main -------------------------------------- #

if __name__ == "__main__":
    key = jax.random.PRNGKey(0)
    k_x, k_p = jax.random.split(key)

    B, C_IN, L = 24, 22, 128          # L=128 -> L1=63, L2=21, L3=10, L4=3
    x = jax.random.normal(k_x, (B, C_IN, L), jnp.float32)
    params = init_params(k_p, in_ch=C_IN, num_classes=2)

    # block_b=16 -> Bblk=16, Bp=32, grid=(2,): >=2 parallel steps (v7x megacore)
    # and exercises the batch-padding path.
    fwd = jax.jit(lambda xx: eeg1d_convnet(xx, params, block_b=16))
    out = jax.block_until_ready(fwd(x))

    assert out.shape == (B, 2), out.shape
    assert bool(jnp.all(jnp.isfinite(out)))
    # softmax rows sum to ~1 (approx reciprocal + bf16 tolerance)
    assert bool(jnp.all(jnp.abs(jnp.sum(out, axis=1) - 1.0) < 5e-3))
    # cross-check against a pure-JAX float32 reference (bf16 MXU tolerance)
    ref = jax.block_until_ready(reference_forward(x, params))
    assert bool(jnp.max(jnp.abs(out - ref)) < 5e-2), float(jnp.max(jnp.abs(out - ref)))
    print("KERNEL_OK")
</pallas_src>

<mosaic_0001>
module attributes {stable_mosaic.version = 11 : i64} {
  func.func @kernel(%arg0: i32, %arg1: memref<63x16x66xbf16, #tpu.memory_space<vmem>>, %arg2: memref<66x32xbf16, #tpu.memory_space<vmem>>, %arg3: memref<1x32xf32, #tpu.memory_space<vmem>>, %arg4: memref<3x32x64xbf16, #tpu.memory_space<vmem>>, %arg5: memref<1x64xf32, #tpu.memory_space<vmem>>, %arg6: memref<192x256xbf16, #tpu.memory_space<vmem>>, %arg7: memref<1x256xf32, #tpu.memory_space<vmem>>, %arg8: memref<256x2xbf16, #tpu.memory_space<vmem>>, %arg9: memref<1x2xf32, #tpu.memory_space<vmem>>, %arg10: memref<16x2xf32, #tpu.memory_space<vmem>>, %arg11: memref<63x16x32xf32, #tpu.memory_space<vmem>>) attributes {dimension_semantics = [#tpu.dimension_semantics<parallel>], iteration_bounds = array<i64: 2>, scalar_prefetch = 0 : i64, scratch_operands = 1 : i64, tpu.core_type = #tpu.core_type<tc>, window_params = [{transform_indices = @transform_0, window_bounds = array<i64: 63, 16, 66>}, {pipeline_mode = #tpu.pipeline_mode<synchronous>, transform_indices = @transform_1, window_bounds = array<i64: 66, 32>}, {pipeline_mode = #tpu.pipeline_mode<synchronous>, transform_indices = @transform_2, window_bounds = array<i64: 1, 32>}, {pipeline_mode = #tpu.pipeline_mode<synchronous>, transform_indices = @transform_3, window_bounds = array<i64: 3, 32, 64>}, {pipeline_mode = #tpu.pipeline_mode<synchronous>, transform_indices = @transform_4, window_bounds = array<i64: 1, 64>}, {pipeline_mode = #tpu.pipeline_mode<synchronous>, transform_indices = @transform_5, window_bounds = array<i64: 192, 256>}, {pipeline_mode = #tpu.pipeline_mode<synchronous>, transform_indices = @transform_6, window_bounds = array<i64: 1, 256>}, {pipeline_mode = #tpu.pipeline_mode<synchronous>, transform_indices = @transform_7, window_bounds = array<i64: 256, 2>}, {pipeline_mode = #tpu.pipeline_mode<synchronous>, transform_indices = @transform_8, window_bounds = array<i64: 1, 2>}, {transform_indices = @transform_9, window_bounds = array<i64: 16, 2>}]} {
    %c0 = arith.constant 0 : index
    %c0_0 = arith.constant 0 : index
    %c0_1 = arith.constant 0 : index
    %0 = vector.load %arg1[%c0, %c0_0, %c0_1] : memref<63x16x66xbf16, #tpu.memory_space<vmem>>, vector<63x16x66xbf16>
    %1 = vector.shape_cast %0 : vector<63x16x66xbf16> to vector<1008x66xbf16>
    %c0_2 = arith.constant 0 : index
    %c0_3 = arith.constant 0 : index
    %2 = vector.load %arg2[%c0_2, %c0_3] : memref<66x32xbf16, #tpu.memory_space<vmem>>, vector<66x32xbf16>
    %cst = arith.constant dense<0.000000e+00> : vector<1008x32xf32>
    %3 = tpu.matmul %1, %2, %cst {dimension_numbers = #tpu.dot_dimension_numbers<[1], [0], [0], [1], [0, 0, 1, 1], [], []>} : vector<1008x66xbf16>, vector<66x32xbf16>, vector<1008x32xf32> -> vector<1008x32xf32>
    %c0_4 = arith.constant 0 : index
    %c0_5 = arith.constant 0 : index
    %4 = vector.load %arg3[%c0_4, %c0_5] : memref<1x32xf32, #tpu.memory_space<vmem>>, vector<1x32xf32>
    %5 = vector.broadcast %4 : vector<1x32xf32> to vector<1008x32xf32>
    %6 = arith.addf %3, %5 : vector<1008x32xf32>
    %7 = vector.shape_cast %6 : vector<1008x32xf32> to vector<63x16x32xf32>
    %c0_6 = arith.constant 0 : index
    %c0_7 = arith.constant 0 : index
    %c0_8 = arith.constant 0 : index
    %8 = vector.load %arg11[%c0_6, %c0_7, %c0_8] : memref<63x16x32xf32, #tpu.memory_space<vmem>>, vector<63x16x32xf32>
    tpu.vector_store %arg11[%c0_6, %c0_7, %c0_8], %7 {strides = array<i32>} : memref<63x16x32xf32, #tpu.memory_space<vmem>>, vector<63x16x32xf32>,
    %c0_9 = arith.constant 0 : index
    %c0_10 = arith.constant 0 : index
    %c0_11 = arith.constant 0 : index
    %9 = tpu.strided_load %arg11[%c0_9, %c0_10, %c0_11] {strides = array<i32: 6, 1, 1>} : memref<63x16x32xf32, #tpu.memory_space<vmem>>, vector<11x16x32xf32>
    %c1 = arith.constant 1 : index
    %c0_12 = arith.constant 0 : index
    %c0_13 = arith.constant 0 : index
    %10 = tpu.strided_load %arg11[%c1, %c0_12, %c0_13] {strides = array<i32: 6, 1, 1>} : memref<63x16x32xf32, #tpu.memory_space<vmem>>, vector<11x16x32xf32>
    %11 = arith.maximumf %9, %10 : vector<11x16x32xf32>
    %c2 = arith.constant 2 : index
    %c0_14 = arith.constant 0 : index
    %c0_15 = arith.constant 0 : index
    %12 = tpu.strided_load %arg11[%c2, %c0_14, %c0_15] {strides = array<i32: 6, 1, 1>} : memref<63x16x32xf32, #tpu.memory_space<vmem>>, vector<11x16x32xf32>
    %13 = arith.maximumf %11, %12 : vector<11x16x32xf32>
    %c3 = arith.constant 3 : index
    %c0_16 = arith.constant 0 : index
    %c0_17 = arith.constant 0 : index
    %14 = tpu.strided_load %arg11[%c3, %c0_16, %c0_17] {strides = array<i32: 6, 1, 1>} : memref<63x16x32xf32, #tpu.memory_space<vmem>>, vector<10x16x32xf32>
    %c4 = arith.constant 4 : index
    %c0_18 = arith.constant 0 : index
    %c0_19 = arith.constant 0 : index
    %15 = tpu.strided_load %arg11[%c4, %c0_18, %c0_19] {strides = array<i32: 6, 1, 1>} : memref<63x16x32xf32, #tpu.memory_space<vmem>>, vector<10x16x32xf32>
    %16 = arith.maximumf %14, %15 : vector<10x16x32xf32>
    %c5 = arith.constant 5 : index
    %c0_20 = arith.constant 0 : index
    %c0_21 = arith.constant 0 : index
    %17 = tpu.strided_load %arg11[%c5, %c0_20, %c0_21] {strides = array<i32: 6, 1, 1>} : memref<63x16x32xf32, #tpu.memory_space<vmem>>, vector<10x16x32xf32>
    %18 = arith.maximumf %16, %17 : vector<10x16x32xf32>
    %19 = vector.extract_strided_slice %13 {offsets = [0, 0, 0], sizes = [10, 16, 32], strides = [1, 1, 1]} : vector<11x16x32xf32> to vector<10x16x32xf32>
    %20 = vector.extract_strided_slice %13 {offsets = [1, 0, 0], sizes = [10, 16, 32], strides = [1, 1, 1]} : vector<11x16x32xf32> to vector<10x16x32xf32>
    %21 = arith.truncf %19 : vector<10x16x32xf32> to vector<10x16x32xbf16>
    %22 = vector.shape_cast %21 : vector<10x16x32xbf16> to vector<160x32xbf16>
    %c0_22 = arith.constant 0 : index
    %c0_23 = arith.constant 0 : index
    %c0_24 = arith.constant 0 : index
    %23 = vector.load %arg4[%c0_22, %c0_23, %c0_24] : memref<3x32x64xbf16, #tpu.memory_space<vmem>>, vector<1x32x64xbf16>
    %24 = vector.shape_cast %23 : vector<1x32x64xbf16> to vector<32x64xbf16>
    %cst_25 = arith.constant dense<0.000000e+00> : vector<160x64xf32>
    %25 = tpu.matmul %22, %24, %cst_25 {dimension_numbers = #tpu.dot_dimension_numbers<[1], [0], [0], [1], [0, 0, 1, 1], [], []>} : vector<160x32xbf16>, vector<32x64xbf16>, vector<160x64xf32> -> vector<160x64xf32>
    %26 = arith.truncf %18 : vector<10x16x32xf32> to vector<10x16x32xbf16>
    %27 = vector.shape_cast %26 : vector<10x16x32xbf16> to vector<160x32xbf16>
    %c1_26 = arith.constant 1 : index
    %c0_27 = arith.constant 0 : index
    %c0_28 = arith.constant 0 : index
    %28 = vector.load %arg4[%c1_26, %c0_27, %c0_28] : memref<3x32x64xbf16, #tpu.memory_space<vmem>>, vector<1x32x64xbf16>
    %29 = vector.shape_cast %28 : vector<1x32x64xbf16> to vector<32x64xbf16>
    %cst_29 = arith.constant dense<0.000000e+00> : vector<160x64xf32>
    %30 = tpu.matmul %27, %29, %cst_29 {dimension_numbers = #tpu.dot_dimension_numbers<[1], [0], [0], [1], [0, 0, 1, 1], [], []>} : vector<160x32xbf16>, vector<32x64xbf16>, vector<160x64xf32> -> vector<160x64xf32>
    %31 = arith.addf %25, %30 : vector<160x64xf32>
    %32 = arith.truncf %20 : vector<10x16x32xf32> to vector<10x16x32xbf16>
    %33 = vector.shape_cast %32 : vector<10x16x32xbf16> to vector<160x32xbf16>
    %c2_30 = arith.constant 2 : index
    %c0_31 = arith.constant 0 : index
    %c0_32 = arith.constant 0 : index
    %34 = vector.load %arg4[%c2_30, %c0_31, %c0_32] : memref<3x32x64xbf16, #tpu.memory_space<vmem>>, vector<1x32x64xbf16>
    %35 = vector.shape_cast %34 : vector<1x32x64xbf16> to vector<32x64xbf16>
    %cst_33 = arith.constant dense<0.000000e+00> : vector<160x64xf32>
    %36 = tpu.matmul %33, %35, %cst_33 {dimension_numbers = #tpu.dot_dimension_numbers<[1], [0], [0], [1], [0, 0, 1, 1], [], []>} : vector<160x32xbf16>, vector<32x64xbf16>, vector<160x64xf32> -> vector<160x64xf32>
    %37 = arith.addf %31, %36 : vector<160x64xf32>
    %c0_34 = arith.constant 0 : index
    %c0_35 = arith.constant 0 : index
    %38 = vector.load %arg5[%c0_34, %c0_35] : memref<1x64xf32, #tpu.memory_space<vmem>>, vector<1x64xf32>
    %39 = vector.broadcast %38 : vector<1x64xf32> to vector<160x64xf32>
    %40 = arith.addf %37, %39 : vector<160x64xf32>
    %41 = vector.shape_cast %40 : vector<160x64xf32> to vector<10x16x64xf32>
    %42 = vector.extract_strided_slice %41 {offsets = [0, 0, 0], sizes = [1, 16, 64], strides = [1, 1, 1]} : vector<10x16x64xf32> to vector<1x16x64xf32>
    %43 = vector.shape_cast %42 : vector<1x16x64xf32> to vector<16x64xf32>
    %44 = vector.extract_strided_slice %41 {offsets = [1, 0, 0], sizes = [1, 16, 64], strides = [1, 1, 1]} : vector<10x16x64xf32> to vector<1x16x64xf32>
    %45 = vector.shape_cast %44 : vector<1x16x64xf32> to vector<16x64xf32>
    %46 = arith.maximumf %43, %45 : vector<16x64xf32>
    %47 = vector.extract_strided_slice %41 {offsets = [2, 0, 0], sizes = [1, 16, 64], strides = [1, 1, 1]} : vector<10x16x64xf32> to vector<1x16x64xf32>
    %48 = vector.shape_cast %47 : vector<1x16x64xf32> to vector<16x64xf32>
    %49 = arith.maximumf %46, %48 : vector<16x64xf32>
    %50 = arith.truncf %49 : vector<16x64xf32> to vector<16x64xbf16>
    %c0_36 = arith.constant 0 : index
    %c0_37 = arith.constant 0 : index
    %51 = vector.load %arg6[%c0_36, %c0_37] : memref<192x256xbf16, #tpu.memory_space<vmem>>, vector<64x256xbf16>
    %cst_38 = arith.constant dense<0.000000e+00> : vector<16x256xf32>
    %52 = tpu.matmul %50, %51, %cst_38 {dimension_numbers = #tpu.dot_dimension_numbers<[1], [0], [0], [1], [0, 0, 1, 1], [], []>} : vector<16x64xbf16>, vector<64x256xbf16>, vector<16x256xf32> -> vector<16x256xf32>
    %53 = vector.extract_strided_slice %41 {offsets = [3, 0, 0], sizes = [1, 16, 64], strides = [1, 1, 1]} : vector<10x16x64xf32> to vector<1x16x64xf32>
    %54 = vector.shape_cast %53 : vector<1x16x64xf32> to vector<16x64xf32>
    %55 = vector.extract_strided_slice %41 {offsets = [4, 0, 0], sizes = [1, 16, 64], strides = [1, 1, 1]} : vector<10x16x64xf32> to vector<1x16x64xf32>
    %56 = vector.shape_cast %55 : vector<1x16x64xf32> to vector<16x64xf32>
    %57 = arith.maximumf %54, %56 : vector<16x64xf32>
    %58 = vector.extract_strided_slice %41 {offsets = [5, 0, 0], sizes = [1, 16, 64], strides = [1, 1, 1]} : vector<10x16x64xf32> to vector<1x16x64xf32>
    %59 = vector.shape_cast %58 : vector<1x16x64xf32> to vector<16x64xf32>
    %60 = arith.maximumf %57, %59 : vector<16x64xf32>
    %61 = arith.truncf %60 : vector<16x64xf32> to vector<16x64xbf16>
    %c64 = arith.constant 64 : index
    %c0_39 = arith.constant 0 : index
    %62 = vector.load %arg6[%c64, %c0_39] : memref<192x256xbf16, #tpu.memory_space<vmem>>, vector<64x256xbf16>
    %cst_40 = arith.constant dense<0.000000e+00> : vector<16x256xf32>
    %63 = tpu.matmul %61, %62, %cst_40 {dimension_numbers = #tpu.dot_dimension_numbers<[1], [0], [0], [1], [0, 0, 1, 1], [], []>} : vector<16x64xbf16>, vector<64x256xbf16>, vector<16x256xf32> -> vector<16x256xf32>
    %64 = arith.addf %52, %63 : vector<16x256xf32>
    %65 = vector.extract_strided_slice %41 {offsets = [6, 0, 0], sizes = [1, 16, 64], strides = [1, 1, 1]} : vector<10x16x64xf32> to vector<1x16x64xf32>
    %66 = vector.shape_cast %65 : vector<1x16x64xf32> to vector<16x64xf32>
    %67 = vector.extract_strided_slice %41 {offsets = [7, 0, 0], sizes = [1, 16, 64], strides = [1, 1, 1]} : vector<10x16x64xf32> to vector<1x16x64xf32>
    %68 = vector.shape_cast %67 : vector<1x16x64xf32> to vector<16x64xf32>
    %69 = arith.maximumf %66, %68 : vector<16x64xf32>
    %70 = vector.extract_strided_slice %41 {offsets = [8, 0, 0], sizes = [1, 16, 64], strides = [1, 1, 1]} : vector<10x16x64xf32> to vector<1x16x64xf32>
    %71 = vector.shape_cast %70 : vector<1x16x64xf32> to vector<16x64xf32>
    %72 = arith.maximumf %69, %71 : vector<16x64xf32>
    %73 = arith.truncf %72 : vector<16x64xf32> to vector<16x64xbf16>
    %c128 = arith.constant 128 : index
    %c0_41 = arith.constant 0 : index
    %74 = vector.load %arg6[%c128, %c0_41] : memref<192x256xbf16, #tpu.memory_space<vmem>>, vector<64x256xbf16>
    %cst_42 = arith.constant dense<0.000000e+00> : vector<16x256xf32>
    %75 = tpu.matmul %73, %74, %cst_42 {dimension_numbers = #tpu.dot_dimension_numbers<[1], [0], [0], [1], [0, 0, 1, 1], [], []>} : vector<16x64xbf16>, vector<64x256xbf16>, vector<16x256xf32> -> vector<16x256xf32>
    %76 = arith.addf %64, %75 : vector<16x256xf32>
    %c0_43 = arith.constant 0 : index
    %c0_44 = arith.constant 0 : index
    %77 = vector.load %arg7[%c0_43, %c0_44] : memref<1x256xf32, #tpu.memory_space<vmem>>, vector<1x256xf32>
    %78 = vector.broadcast %77 : vector<1x256xf32> to vector<16x256xf32>
    %79 = arith.addf %76, %78 : vector<16x256xf32>
    %cst_45 = arith.constant 0.000000e+00 : f32
    %80 = vector.broadcast %cst_45 : f32 to vector<16x256xf32>
    %81 = arith.maximumf %79, %80 : vector<16x256xf32>
    %82 = arith.truncf %81 : vector<16x256xf32> to vector<16x256xbf16>
    %c0_46 = arith.constant 0 : index
    %c0_47 = arith.constant 0 : index
    %83 = vector.load %arg8[%c0_46, %c0_47] : memref<256x2xbf16, #tpu.memory_space<vmem>>, vector<256x2xbf16>
    %cst_48 = arith.constant dense<0.000000e+00> : vector<16x2xf32>
    %84 = tpu.matmul %82, %83, %cst_48 {dimension_numbers = #tpu.dot_dimension_numbers<[1], [0], [0], [1], [0, 0, 1, 1], [], []>} : vector<16x256xbf16>, vector<256x2xbf16>, vector<16x2xf32> -> vector<16x2xf32>
    %c0_49 = arith.constant 0 : index
    %c0_50 = arith.constant 0 : index
    %85 = vector.load %arg9[%c0_49, %c0_50] : memref<1x2xf32, #tpu.memory_space<vmem>>, vector<1x2xf32>
    %86 = vector.broadcast %85 : vector<1x2xf32> to vector<16x2xf32>
    %87 = arith.addf %84, %86 : vector<16x2xf32>
    %cst_51 = arith.constant dense<0xFF800000> : vector<16xf32>
    %88 = vector.multi_reduction <maximumf>, %87, %cst_51 [1] : vector<16x2xf32> to vector<16xf32>
    %89 = vector.shape_cast %88 : vector<16xf32> to vector<16x1xf32>
    %90 = vector.broadcast %89 : vector<16x1xf32> to vector<16x2xf32>
    %91 = arith.subf %87, %90 : vector<16x2xf32>
    %92 = math.exp %91 : vector<16x2xf32>
    %cst_52 = arith.constant dense<0.000000e+00> : vector<16xf32>
    %93 = vector.multi_reduction <add>, %92, %cst_52 [1] : vector<16x2xf32> to vector<16xf32>
    %94 = vector.shape_cast %93 : vector<16xf32> to vector<16x1xf32>
    %95 = tpu.reciprocal %94 {approx = true} : vector<16x1xf32> -> vector<16x1xf32>
    %96 = vector.broadcast %95 : vector<16x1xf32> to vector<16x2xf32>
    %97 = arith.mulf %92, %96 : vector<16x2xf32>
    %c0_53 = arith.constant 0 : index
    %c0_54 = arith.constant 0 : index
    %98 = vector.load %arg10[%c0_53, %c0_54] : memref<16x2xf32, #tpu.memory_space<vmem>>, vector<16x2xf32>
    tpu.vector_store %arg10[%c0_53, %c0_54], %97 {strides = array<i32>} : memref<16x2xf32, #tpu.memory_space<vmem>>, vector<16x2xf32>,
    return
  }
  func.func @transform_0(%arg0: i32) -> (i32, i32, i32) {
    %c0_i32 = arith.constant 0 : i32
    %c0_i32_0 = arith.constant 0 : i32
    %c0_i32_1 = arith.constant 0 : i32
    return %c0_i32, %arg0, %c0_i32_0 : i32, i32, i32
  }
  func.func @transform_1(%arg0: i32) -> (i32, i32) {
    %c0_i32 = arith.constant 0 : i32
    %c0_i32_0 = arith.constant 0 : i32
    %c0_i32_1 = arith.constant 0 : i32
    return %c0_i32, %c0_i32_0 : i32, i32
  }
  func.func @transform_2(%arg0: i32) -> (i32, i32) {
    %c0_i32 = arith.constant 0 : i32
    %c0_i32_0 = arith.constant 0 : i32
    %c0_i32_1 = arith.constant 0 : i32
    return %c0_i32, %c0_i32_0 : i32, i32
  }
  func.func @transform_3(%arg0: i32) -> (i32, i32, i32) {
    %c0_i32 = arith.constant 0 : i32
    %c0_i32_0 = arith.constant 0 : i32
    %c0_i32_1 = arith.constant 0 : i32
    %c0_i32_2 = arith.constant 0 : i32
    return %c0_i32, %c0_i32_0, %c0_i32_1 : i32, i32, i32
  }
  func.func @transform_4(%arg0: i32) -> (i32, i32) {
    %c0_i32 = arith.constant 0 : i32
    %c0_i32_0 = arith.constant 0 : i32
    %c0_i32_1 = arith.constant 0 : i32
    return %c0_i32, %c0_i32_0 : i32, i32
  }
  func.func @transform_5(%arg0: i32) -> (i32, i32) {
    %c0_i32 = arith.constant 0 : i32
    %c0_i32_0 = arith.constant 0 : i32
    %c0_i32_1 = arith.constant 0 : i32
    return %c0_i32, %c0_i32_0 : i32, i32
  }
  func.func @transform_6(%arg0: i32) -> (i32, i32) {
    %c0_i32 = arith.constant 0 : i32
    %c0_i32_0 = arith.constant 0 : i32
    %c0_i32_1 = arith.constant 0 : i32
    return %c0_i32, %c0_i32_0 : i32, i32
  }
  func.func @transform_7(%arg0: i32) -> (i32, i32) {
    %c0_i32 = arith.constant 0 : i32
    %c0_i32_0 = arith.constant 0 : i32
    %c0_i32_1 = arith.constant 0 : i32
    return %c0_i32, %c0_i32_0 : i32, i32
  }
  func.func @transform_8(%arg0: i32) -> (i32, i32) {
    %c0_i32 = arith.constant 0 : i32
    %c0_i32_0 = arith.constant 0 : i32
    %c0_i32_1 = arith.constant 0 : i32
    return %c0_i32, %c0_i32_0 : i32, i32
  }
  func.func @transform_9(%arg0: i32) -> (i32, i32) {
    %c0_i32 = arith.constant 0 : i32
    %c0_i32_0 = arith.constant 0 : i32
    return %arg0, %c0_i32 : i32, i32
  }
}

</mosaic_0001>

<bundles_post_ra>
// kernel: _lambda_.1
= control target key start
LH: loop header
LB: loop body
LE: loop exit
PB: predicated region body
PF: predicated region fallthrough
CT: control target
= control target key end

     0   :  { %s4023_s30 = smov 0   ;;  %s4025_s10 = smov 0   ;;  %s4943_s0 = inlined_call_operand.vmem [shape: bf16[63,32,66], index: 0, kind: input, shape index: {}]   ;;  %s4944_s1 = inlined_call_operand.vmem [shape: bf16[66,32], index: 1, kind: input, shape index: {}]   ;;  %s4945_s2 = inlined_call_operand.vmem [shape: f32[1,32], index: 2, kind: input, shape index: {}]   ;;  %s4946_s3 = inlined_call_operand.vmem [shape: bf16[3,32,64], index: 3, kind: input, shape index: {}]   ;;  %s4947_s4 = inlined_call_operand.vmem [shape: f32[1,64], index: 4, kind: input, shape index: {}]   ;;  %s4948_s5 = inlined_call_operand.vmem [shape: bf16[192,256], index: 5, kind: input, shape index: {}]   ;;  %s4949_s6 = inlined_call_operand.vmem [shape: f32[1,256], index: 6, kind: input, shape index: {}]   ;;  %s4950_s7 = inlined_call_operand.vmem [shape: bf16[256,2], index: 7, kind: input, shape index: {}]   ;;  %s4951_s8 = inlined_call_operand.vmem [shape: f32[1,2], index: 8, kind: input, shape index: {}]   ;;  %s4952_s9 = inlined_call_operand.vmem [shape: f32[32,2], index: 9, kind: output, shape index: {}]  }
   0x1   :  { %s4027_s11 = smov 0  }
   0x2 LB: > { %s3212_s12 = sadd.s32 4294967295, %s3971_s11   ;;  %s4040_s13 = sadd.s32 1, %s3971_s11   ;;  %s3971_s11 = sphi %s4027_s11, %s4955_s11   ;;  %s3967_s10 = sphi %s4025_s10, %s4954_s10   ;;  %s3963_s30 = sphi %s4023_s30, %s4953_s30  }
   0x3   : > { %s23_s14 = ssub.s32 %s3971_s11, %s4040_s13  ;;  %s26_s15 = sadd.s32 1, %s3967_s10 }
   0x4   : > { %p24_p0 = scmp.eq.s32.totalorder %s23_s14, 0  ;;  %p33_p1 = scmp.ne.s32.totalorder %s3967_s10, %s3963_s30 }
   0x5   : > { %p34_p2 = scmp.eq.s32.totalorder %s3971_s11, 0  ;;  %p3215_p4 = scmp.ge.s32.totalorder %s3971_s11, 2 }
   0x6   : > { %s4049_s16 = scalar_select %p24_p0, %s3967_s10, %s26_s15  }
   0x7   : > { %p35_p3 = por %p34_p2, %p33_p1  ;;  %277 = sbr.rel (%p3215_p4) target bundleno = 79 (0x4f), region = 48 }
   0xc   : > { %280 = sbr.rel (!%p35_p3) target bundleno = 79 (0x4f), region = 52  ;;  %s282_s17 = sand.u32 (%p35_p3), 1, %s3967_s10  }
   0xd   : > { %s3782_s18 = sshll.u32 (%p35_p3), %s3971_s11, 3  ;;  %s3911_s19 = smul.u32 (%p35_p3), 504, %s282_s17 }
   0xe   : > { %s4057_s22 = scalar_lea.vmem (%p35_p3), %s4943_s0, %s3782_s18 }
   0xf   : > { %v304_v0 = vld [vmem:[%s4057_s22] sm:$0xff] (%p35_p3)   ;;  %v308_v1 = vld [vmem:[%s4057_s22 + $0x10] sm:$0xff] (%p35_p3)   ;;  %s4062_s23 = scalar_lea.vmem (%p35_p3), [#allocation3], %s3911_s19 }
  0x10   : > { %v312_v2 = vld [vmem:[%s4057_s22 + $0x20] sm:$0xff] (%p35_p3)   ;;  %305 = vst [vmem:[%s4062_s23] sm:$0xff] (%p35_p3), %v304_v0   ;;  %v316_v3 = vld [vmem:[%s4057_s22 + $0x30] sm:$0xff] (%p35_p3)  }
  0x11   : > { %309 = vst [vmem:[%s4062_s23 + $0x8] sm:$0xff] %v308_v1   ;;  %v320_v4 = vld [vmem:[%s4057_s22 + $0x40] sm:$0xff]   ;;  %v324_v5 = vld [vmem:[%s4057_s22 + $0x50] sm:$0xff]  }
  0x12   : > { %313 = vst [vmem:[%s4062_s23 + $0x10] sm:$0xff] %v312_v2   ;;  %v328_v6 = vld [vmem:[%s4057_s22 + $0x60] sm:$0xff]   ;;  %v332_v7 = vld [vmem:[%s4057_s22 + $0x70] sm:$0xff]  }
  0x13   : > { %317 = vst [vmem:[%s4062_s23 + $0x18] sm:$0xff] %v316_v3   ;;  %v336_v8 = vld [vmem:[%s4057_s22 + $0x80] sm:$0xff]   ;;  %v340_v9 = vld [vmem:[%s4057_s22 + $0x90] sm:$0xff]  }
  0x14   : > { %321 = vst [vmem:[%s4062_s23 + $0x20] sm:$0xff] %v320_v4   ;;  %v344_v10 = vld [vmem:[%s4057_s22 + $0xa0] sm:$0xff]   ;;  %v348_v11 = vld [vmem:[%s4057_s22 + $0xb0] sm:$0xff]  }
  0x15   : > { %325 = vst [vmem:[%s4062_s23 + $0x28] sm:$0xff] %v324_v5   ;;  %v352_v12 = vld [vmem:[%s4057_s22 + $0xc0] sm:$0xff]   ;;  %v356_v13 = vld [vmem:[%s4057_s22 + $0xd0] sm:$0xff]  }
  0x16   : > { %329 = vst [vmem:[%s4062_s23 + $0x30] sm:$0xff] %v328_v6   ;;  %v360_v14 = vld [vmem:[%s4057_s22 + $0xe0] sm:$0xff]   ;;  %v364_v15 = vld [vmem:[%s4057_s22 + $0xf0] sm:$0xff]  }
  0x17   : > { %333 = vst [vmem:[%s4062_s23 + $0x38] sm:$0xff] %v332_v7   ;;  %v368_v16 = vld [vmem:[%s4057_s22 + $0x100] sm:$0xff]   ;;  %v372_v17 = vld [vmem:[%s4057_s22 + $0x110] sm:$0xff]  }
  0x18   : > { %337 = vst [vmem:[%s4062_s23 + $0x40] sm:$0xff] %v336_v8   ;;  %v376_v18 = vld [vmem:[%s4057_s22 + $0x120] sm:$0xff]   ;;  %v380_v19 = vld [vmem:[%s4057_s22 + $0x130] sm:$0xff]  }
  0x19   : > { %341 = vst [vmem:[%s4062_s23 + $0x48] sm:$0xff] %v340_v9   ;;  %v384_v20 = vld [vmem:[%s4057_s22 + $0x140] sm:$0xff]   ;;  %v388_v21 = vld [vmem:[%s4057_s22 + $0x150] sm:$0xff]  }
  0x1a   : > { %345 = vst [vmem:[%s4062_s23 + $0x50] sm:$0xff] %v344_v10   ;;  %v392_v22 = vld [vmem:[%s4057_s22 + $0x160] sm:$0xff]   ;;  %v396_v23 = vld [vmem:[%s4057_s22 + $0x170] sm:$0xff]  }
  0x1b   : > { %349 = vst [vmem:[%s4062_s23 + $0x58] sm:$0xff] %v348_v11   ;;  %v400_v24 = vld [vmem:[%s4057_s22 + $0x180] sm:$0xff]   ;;  %v404_v25 = vld [vmem:[%s4057_s22 + $0x190] sm:$0xff]  }
  0x1c   : > { %353 = vst [vmem:[%s4062_s23 + $0x60] sm:$0xff] %v352_v12   ;;  %v408_v26 = vld [vmem:[%s4057_s22 + $0x1a0] sm:$0xff]   ;;  %v412_v27 = vld [vmem:[%s4057_s22 + $0x1b0] sm:$0xff]  }
  0x1d   : > { %357 = vst [vmem:[%s4062_s23 + $0x68] sm:$0xff] %v356_v13   ;;  %v416_v28 = vld [vmem:[%s4057_s22 + $0x1c0] sm:$0xff]   ;;  %v420_v29 = vld [vmem:[%s4057_s22 + $0x1d0] sm:$0xff]  }
  0x1e   : > { %361 = vst [vmem:[%s4062_s23 + $0x70] sm:$0xff] %v360_v14   ;;  %v424_v30 = vld [vmem:[%s4057_s22 + $0x1e0] sm:$0xff]   ;;  %v428_v31 = vld [vmem:[%s4057_s22 + $0x1f0] sm:$0xff]  }
  0x1f   : > { %365 = vst [vmem:[%s4062_s23 + $0x78] sm:$0xff] %v364_v15   ;;  %v432_v32 = vld [vmem:[%s4057_s22 + $0x200] sm:$0xff]   ;;  %v436_v33 = vld [vmem:[%s4057_s22 + $0x210] sm:$0xff]  }
  0x20   : > { %369 = vst [vmem:[%s4062_s23 + $0x80] sm:$0xff] %v368_v16   ;;  %v440_v34 = vld [vmem:[%s4057_s22 + $0x220] sm:$0xff]   ;;  %v444_v35 = vld [vmem:[%s4057_s22 + $0x230] sm:$0xff]  }
  0x21   : > { %373 = vst [vmem:[%s4062_s23 + $0x88] sm:$0xff] %v372_v17   ;;  %v448_v36 = vld [vmem:[%s4057_s22 + $0x240] sm:$0xff]   ;;  %v452_v37 = vld [vmem:[%s4057_s22 + $0x250] sm:$0xff]  }
  0x22   : > { %377 = vst [vmem:[%s4062_s23 + $0x90] sm:$0xff] %v376_v18   ;;  %v456_v38 = vld [vmem:[%s4057_s22 + $0x260] sm:$0xff]   ;;  %v460_v39 = vld [vmem:[%s4057_s22 + $0x270] sm:$0xff]  }
  0x23   : > { %381 = vst [vmem:[%s4062_s23 + $0x98] sm:$0xff] %v380_v19   ;;  %v464_v40 = vld [vmem:[%s4057_s22 + $0x280] sm:$0xff]   ;;  %v468_v41 = vld [vmem:[%s4057_s22 + $0x290] sm:$0xff]  }
  0x24   : > { %385 = vst [vmem:[%s4062_s23 + $0xa0] sm:$0xff] %v384_v20   ;;  %v472_v42 = vld [vmem:[%s4057_s22 + $0x2a0] sm:$0xff]   ;;  %v476_v43 = vld [vmem:[%s4057_s22 + $0x2b0] sm:$0xff]  }
  0x25   : > { %389 = vst [vmem:[%s4062_s23 + $0xa8] sm:$0xff] %v388_v21   ;;  %v480_v44 = vld [vmem:[%s4057_s22 + $0x2c0] sm:$0xff]   ;;  %v484_v45 = vld [vmem:[%s4057_s22 + $0x2d0] sm:$0xff]  }
  0x26   : > { %393 = vst [vmem:[%s4062_s23 + $0xb0] sm:$0xff] %v392_v22   ;;  %v488_v46 = vld [vmem:[%s4057_s22 + $0x2e0] sm:$0xff]   ;;  %v492_v47 = vld [vmem:[%s4057_s22 + $0x2f0] sm:$0xff]  }
  0x27   : > { %397 = vst [vmem:[%s4062_s23 + $0xb8] sm:$0xff] %v396_v23   ;;  %v496_v48 = vld [vmem:[%s4057_s22 + $0x300] sm:$0xff]   ;;  %v500_v49 = vld [vmem:[%s4057_s22 + $0x310] sm:$0xff]  }
  0x28   : > { %401 = vst [vmem:[%s4062_s23 + $0xc0] sm:$0xff] %v400_v24   ;;  %v504_v50 = vld [vmem:[%s4057_s22 + $0x320] sm:$0xff]   ;;  %v508_v51 = vld [vmem:[%s4057_s22 + $0x330] sm:$0xff]  }
  0x29   : > { %405 = vst [vmem:[%s4062_s23 + $0xc8] sm:$0xff] %v404_v25   ;;  %v512_v52 = vld [vmem:[%s4057_s22 + $0x340] sm:$0xff]   ;;  %v516_v53 = vld [vmem:[%s4057_s22 + $0x350] sm:$0xff]  }
  0x2a   : > { %409 = vst [vmem:[%s4062_s23 + $0xd0] sm:$0xff] %v408_v26   ;;  %v520_v54 = vld [vmem:[%s4057_s22 + $0x360] sm:$0xff]   ;;  %v524_v55 = vld [vmem:[%s4057_s22 + $0x370] sm:$0xff]  }
  0x2b   : > { %413 = vst [vmem:[%s4062_s23 + $0xd8] sm:$0xff] %v412_v27   ;;  %v528_v56 = vld [vmem:[%s4057_s22 + $0x380] sm:$0xff]   ;;  %v532_v57 = vld [vmem:[%s4057_s22 + $0x390] sm:$0xff]  }
  0x2c   : > { %417 = vst [vmem:[%s4062_s23 + $0xe0] sm:$0xff] %v416_v28   ;;  %v536_v58 = vld [vmem:[%s4057_s22 + $0x3a0] sm:$0xff]   ;;  %v540_v59 = vld [vmem:[%s4057_s22 + $0x3b0] sm:$0xff]  }
  0x2d   : > { %421 = vst [vmem:[%s4062_s23 + $0xe8] sm:$0xff] %v420_v29   ;;  %v544_v60 = vld [vmem:[%s4057_s22 + $0x3c0] sm:$0xff]   ;;  %v548_v61 = vld [vmem:[%s4057_s22 + $0x3d0] sm:$0xff]  }
  0x2e   : > { %425 = vst [vmem:[%s4062_s23 + $0xf0] sm:$0xff] %v424_v30   ;;  %v552_v62 = vld [vmem:[%s4057_s22 + $0x3e0] sm:$0xff]  }
  0x2f   : > { %429 = vst [vmem:[%s4062_s23 + $0xf8] sm:$0xff] %v428_v31  }
  0x30   : > { %433 = vst [vmem:[%s4062_s23 + $0x100] sm:$0xff] %v432_v32  }
  0x31   : > { %437 = vst [vmem:[%s4062_s23 + $0x108] sm:$0xff] %v436_v33  }
  0x32   : > { %441 = vst [vmem:[%s4062_s23 + $0x110] sm:$0xff] %v440_v34  }
  0x33   : > { %445 = vst [vmem:[%s4062_s23 + $0x118] sm:$0xff] %v444_v35  }
  0x34   : > { %449 = vst [vmem:[%s4062_s23 + $0x120] sm:$0xff] %v448_v36  }
  0x35   : > { %453 = vst [vmem:[%s4062_s23 + $0x128] sm:$0xff] %v452_v37  }
  0x36   : > { %457 = vst [vmem:[%s4062_s23 + $0x130] sm:$0xff] %v456_v38  }
  0x37   : > { %461 = vst [vmem:[%s4062_s23 + $0x138] sm:$0xff] %v460_v39  }
  0x38   : > { %465 = vst [vmem:[%s4062_s23 + $0x140] sm:$0xff] %v464_v40  }
  0x39   : > { %469 = vst [vmem:[%s4062_s23 + $0x148] sm:$0xff] %v468_v41  }
  0x3a   : > { %473 = vst [vmem:[%s4062_s23 + $0x150] sm:$0xff] %v472_v42  }
  0x3b   : > { %477 = vst [vmem:[%s4062_s23 + $0x158] sm:$0xff] %v476_v43  }
  0x3c   : > { %481 = vst [vmem:[%s4062_s23 + $0x160] sm:$0xff] %v480_v44  }
  0x3d   : > { %485 = vst [vmem:[%s4062_s23 + $0x168] sm:$0xff] %v484_v45  }
  0x3e   : > { %489 = vst [vmem:[%s4062_s23 + $0x170] sm:$0xff] %v488_v46  }
  0x3f   : > { %493 = vst [vmem:[%s4062_s23 + $0x178] sm:$0xff] %v492_v47  }
  0x40   : > { %497 = vst [vmem:[%s4062_s23 + $0x180] sm:$0xff] %v496_v48  }
  0x41   : > { %501 = vst [vmem:[%s4062_s23 + $0x188] sm:$0xff] %v500_v49  }
  0x42   : > { %505 = vst [vmem:[%s4062_s23 + $0x190] sm:$0xff] %v504_v50  }
  0x43   : > { %509 = vst [vmem:[%s4062_s23 + $0x198] sm:$0xff] %v508_v51  }
  0x44   : > { %513 = vst [vmem:[%s4062_s23 + $0x1a0] sm:$0xff] %v512_v52  }
  0x45   : > { %517 = vst [vmem:[%s4062_s23 + $0x1a8] sm:$0xff] %v516_v53  }
  0x46   : > { %521 = vst [vmem:[%s4062_s23 + $0x1b0] sm:$0xff] %v520_v54  }
  0x47   : > { %525 = vst [vmem:[%s4062_s23 + $0x1b8] sm:$0xff] %v524_v55  }
  0x48   : > { %529 = vst [vmem:[%s4062_s23 + $0x1c0] sm:$0xff] %v528_v56  }
  0x49   : > { %533 = vst [vmem:[%s4062_s23 + $0x1c8] sm:$0xff] %v532_v57  }
  0x4a   : > { %537 = vst [vmem:[%s4062_s23 + $0x1d0] sm:$0xff] %v536_v58  }
  0x4b   : > { %541 = vst [vmem:[%s4062_s23 + $0x1d8] sm:$0xff] %v540_v59  }
  0x4c   : > { %545 = vst [vmem:[%s4062_s23 + $0x1e0] sm:$0xff] %v544_v60  }
  0x4d   : > { %549 = vst [vmem:[%s4062_s23 + $0x1e8] sm:$0xff] %v548_v61  }
  0x4e   : > { %553 = vst [vmem:[%s4062_s23 + $0x1f0] sm:$0xff] %v552_v62  }
  0x4f PF: > { %p3218_p5 = scmp.ge.s32.totalorder %s3971_s11, 1  ;;  %p830_p6 = scmp.lt.s32.totalorder %s3971_s11, 3 }
  0x51   : > { %p831_p7 = pnand %p3218_p5, %p830_p6 }
  0x52   : > { %s837_s14 = sand.u32 (!%p831_p7), 1, %s3963_s30   ;;  %s3219_s27 = sshll.u32 (!%p831_p7), %s3212_s12, 1 }
  0x53   : > { %834 = sbr.rel (%p831_p7) target bundleno = 1441 (0x5a1), region = 93  ;;  %p874_p8 = scmp.lt.s32.totalorder (!%p831_p7), %s3219_s27, 3 }
  0x54   : > { %s3912_s18 = smul.u32 (!%p831_p7), 504, %s837_s14 }
  0x56   : > { %s4205_s30 = scalar_lea.vmem (!%p831_p7), [#allocation3], %s3912_s18 }
  0x58   : > { %v1014_v63 = vld [vmem:[%s4944_s1 + $0x20] sm:$0x1]  ;;  %vm1551_vm0 = vcmask 1040384   ;;  %v3849_v3 = vld [vmem:[%s4944_s1 + $0x18] sm:$0xff]  ;;  %v3848_v4 = vld [vmem:[%s4944_s1 + $0x10] sm:$0xff]  ;;  %vm1361_vm1 = vcmask 539648  }
  0x59   : > { %v1351_v0 = vunpack.c.l.b16 %v1014_v63  ;;  %v3847_v5 = vld [vmem:[%s4944_s1 + $0x8] sm:$0xff]  ;;  %v3846_v6 = vld [vmem:[%s4944_s1] sm:$0xff]  ;;  %v3784_v10 = vld [vmem:[%s4205_s30 + $0x8] sm:$0xff]  ;;  %vm1879_vm2 = vcmask 261120   ;;  %vm2758_vm3 = vcmask 523264   ;;  %vm3125_vm4 = vcmask 15360  }
  0x5a   : > { %v3783_v7 = vld [vmem:[%s4205_s30] sm:$0xff]  ;;  %v3821_v8 = vld [vmem:[%s4205_s30 + $0x130] sm:$0xff]  ;;  %v3822_v11 = vld [vmem:[%s4205_s30 + $0x138] sm:$0xff]  ;;  %s4957_s27 = smov (!%p874_p8, %s3219_s27), 3 }
  0x5b   : > { %v1356_v1 = vpack.c.b16 %v1351_v0, %v1351_v0  ;;  %v3809_v9 = vld [vmem:[%s4205_s30 + $0xd0] sm:$0xff]  ;;  %v3810_v12 = vld [vmem:[%s4205_s30 + $0xd8] sm:$0xff]  ;;  %v3832_v13 = vld [vmem:[%s4205_s30 + $0x188] sm:$0xff]  ;;  %s3220_s28 = sshll.u32 %s4957_s27, 3 }
  0x5c   : > { %v3785_v14 = vld [vmem:[%s4205_s30 + $0x10] sm:$0xff]  ;;  %v3823_v15 = vld [vmem:[%s4205_s30 + $0x140] sm:$0xff]  ;;  %v3786_v18 = vld [vmem:[%s4205_s30 + $0x18] sm:$0xff]  ;;  %s877_s15 = scalar_lea.vmem %s4952_s9, %s3220_s28 }
  0x5d   : > { %v1553_v2 = vsel %vm1551_vm0, %v1356_v1, 0  ;;  %v3811_v16 = vld [vmem:[%s4205_s30 + $0xe0] sm:$0xff]  ;;  %v3833_v17 = vld [vmem:[%s4205_s30 + $0x190] sm:$0xff]  ;;  %v3824_v19 = vld [vmem:[%s4205_s30 + $0x148] sm:$0xff] }
  0x5e   : > { %1558 = vmatpush.bf16.msra.mxu0 %v1553_v2  ;;  %3897 = vmatpush.bf16.msra.mxu2 %v1553_v2  ;;  %v3812_v20 = vld [vmem:[%s4205_s30 + $0xe8] sm:$0xff]  ;;  %v3834_v21 = vld [vmem:[%s4205_s30 + $0x198] sm:$0xff]  ;;  %v3787_v22 = vld [vmem:[%s4205_s30 + $0x20] sm:$0xff] }
  0x5f   : > { %3896 = vmatpush.bf16.msra.mxu1 %v1553_v2  ;;  %3898 = vmatpush.bf16.msra.mxu3 %v1553_v2  ;;  %v3825_v23 = vld [vmem:[%s4205_s30 + $0x150] sm:$0xff]  ;;  %v3835_v25 = vld [vmem:[%s4205_s30 + $0x1a0] sm:$0xff]  ;;  %v3788_v26 = vld [vmem:[%s4205_s30 + $0x28] sm:$0xff] }
  0x60   : > { %v3813_v24 = vld [vmem:[%s4205_s30 + $0xf0] sm:$0xff]  ;;  %v3826_v27 = vld [vmem:[%s4205_s30 + $0x158] sm:$0xff]  ;;  %v3836_v29 = vld [vmem:[%s4205_s30 + $0x1a8] sm:$0xff] }
  0x61   : > { %v3814_v28 = vld [vmem:[%s4205_s30 + $0xf8] sm:$0xff]  ;;  %v3789_v30 = vld [vmem:[%s4205_s30 + $0x30] sm:$0xff]  ;;  %v3827_v31 = vld [vmem:[%s4205_s30 + $0x160] sm:$0xff] }
  0x62   : > { %1559 = vmatpush.bf16.msra.mxu0 %v3849_v3  ;;  %3900 = vmatpush.bf16.msra.mxu2 %v3849_v3  ;;  %v3815_v32 = vld [vmem:[%s4205_s30 + $0x100] sm:$0xff]  ;;  %v3837_v33 = vld [vmem:[%s4205_s30 + $0x1b0] sm:$0xff]  ;;  %v3790_v34 = vld [vmem:[%s4205_s30 + $0x38] sm:$0xff] }
  0x63   : > { %3899 = vmatpush.bf16.msra.mxu1 %v3849_v3  ;;  %3901 = vmatpush.bf16.msra.mxu3 %v3849_v3  ;;  %v3828_v35 = vld [vmem:[%s4205_s30 + $0x168] sm:$0xff]  ;;  %v3838_v37 = vld [vmem:[%s4205_s30 + $0x1b8] sm:$0xff]  ;;  %v3791_v39 = vld [vmem:[%s4205_s30 + $0x40] sm:$0xff] }
  0x64   : > { %v3816_v36 = vld [vmem:[%s4205_s30 + $0x108] sm:$0xff]  ;;  %v4272_v38 = vld [vmem:[%s4945_s2] ss:$0 sm:$0xff]  ;;  %v3839_v49 = vld [vmem:[%s4205_s30 + $0x1c0] sm:$0xff] }
  0x65   : > { %v3829_v40 = vld [vmem:[%s4205_s30 + $0x170] sm:$0xff]  ;;  %v3792_v52 = vld [vmem:[%s4205_s30 + $0x48] sm:$0xff]  ;;  %v3830_v54 = vld [vmem:[%s4205_s30 + $0x178] sm:$0xff] }
  0x66   : > { %1560 = vmatpush.bf16.msra.mxu0 %v3848_v4  ;;  %3903 = vmatpush.bf16.msra.mxu2 %v3848_v4  ;;  %v3817_v48 = vld [vmem:[%s4205_s30 + $0x110] sm:$0xff]  ;;  %v3851_v58 = vld [vmem:[%s4946_s3 + $0x8] sm:$0xff]  ;;  %v3840_v3 = vld [vmem:[%s4205_s30 + $0x1c8] sm:$0xff] }
  0x67   : > { %3902 = vmatpush.bf16.msra.mxu1 %v3848_v4  ;;  %3904 = vmatpush.bf16.msra.mxu3 %v3848_v4  ;;  %v3850_v61 = vld [vmem:[%s4946_s3] sm:$0xff] }
  0x68   : > { %v3818_v2 = vld [vmem:[%s4205_s30 + $0x118] sm:$0xff] }
  0x6a   : > { %1561 = vmatpush.bf16.msra.mxu0 %v3847_v5  ;;  %3906 = vmatpush.bf16.msra.mxu2 %v3847_v5 }
  0x6b   : > { %3905 = vmatpush.bf16.msra.mxu1 %v3847_v5  ;;  %3907 = vmatpush.bf16.msra.mxu3 %v3847_v5 }
  0x6e   : > { %1562 = vmatpush.bf16.msra.mxu0 %v3846_v6  ;;  %3909 = vmatpush.bf16.msra.mxu2 %v3846_v6 }
  0x6f   : > { %3908 = vmatpush.bf16.msra.mxu1 %v3846_v6  ;;  %3910 = vmatpush.bf16.msra.mxu3 %v3846_v6 }
  0x71   : > { %3489 = vmatmul.msk.bf16.vlgmr.msra.gmra.mxu0 %vm1361_vm1, %v3783_v7  ;;  %3527 = vmatmul.msk.bf16.vlgmr.msra.gmra.mxu2 %vm1361_vm1, %v3821_v8  ;;  %v3793_v8 = vld [vmem:[%s4205_s30 + $0x50] sm:$0xff] }
  0x72   : > { %3515 = vmatmul.msk.bf16.vlgmr.msra.gmra.mxu1 %vm1361_vm1, %v3809_v9  ;;  %3538 = vmatmul.msk.bf16.vlgmr.msra.gmra.mxu3 %vm1361_vm1, %v3832_v13 }
  0x73   : > { %2517 = vmatpush.bf16.msrb.mxu2 %v3851_v58  ;;  %v3842_v58 = vld [vmem:[%s4205_s30 + $0x1d8] sm:$0xff] }
  0x77   : > { %2518 = vmatpush.bf16.msrb.mxu2 %v3850_v61 }
  0x81   : > { %3490 = vmatmul.msk.bf16.gmra.mxu0 %vm1361_vm1, %v3784_v10  ;;  %3528 = vmatmul.msk.bf16.gmra.mxu2 %vm1361_vm1, %v3822_v11  ;;  %v3831_v10 = vld [vmem:[%s4205_s30 + $0x180] sm:$0xff] }
  0x82   : > { %3516 = vmatmul.msk.bf16.gmra.mxu1 %vm1361_vm1, %v3810_v12  ;;  %3539 = vmatmul.msk.bf16.gmra.mxu3 %vm1361_vm1, %v3833_v17 }
  0x91   : > { %3491 = vmatmul.msk.bf16.gmra.mxu0 %vm1361_vm1, %v3785_v14  ;;  %3529 = vmatmul.msk.bf16.gmra.mxu2 %vm1361_vm1, %v3823_v15 }
  0x92   : > { %3517 = vmatmul.msk.bf16.gmra.mxu1 %vm1361_vm1, %v3811_v16  ;;  %3540 = vmatmul.msk.bf16.gmra.mxu3 %vm1361_vm1, %v3834_v21 }
  0xa1   : > { %3492 = vmatmul.msk.bf16.gmra.mxu0 %vm1361_vm1, %v3786_v18  ;;  %3530 = vmatmul.msk.bf16.gmra.mxu2 %vm1361_vm1, %v3824_v19 }
  0xa2   : > { %3518 = vmatmul.msk.bf16.gmra.mxu1 %vm1361_vm1, %v3812_v20  ;;  %3541 = vmatmul.msk.bf16.gmra.mxu3 %vm1361_vm1, %v3835_v25 }
  0xb1   : > { %3493 = vmatmul.msk.bf16.gmra.mxu0 %vm1361_vm1, %v3787_v22  ;;  %3531 = vmatmul.msk.bf16.gmra.mxu2 %vm1361_vm1, %v3825_v23  ;;  %v3819_v22 = vld [vmem:[%s4205_s30 + $0x120] sm:$0xff]  ;;  %v3841_v23 = vld [vmem:[%s4205_s30 + $0x1d0] sm:$0xff] }
  0xb2   : > { %3519 = vmatmul.msk.bf16.gmra.mxu1 %vm1361_vm1, %v3813_v24  ;;  %3542 = vmatmul.msk.bf16.gmra.mxu3 %vm1361_vm1, %v3836_v29 }
  0xc1   : > { %3494 = vmatmul.msk.bf16.gmra.mxu0 %vm1361_vm1, %v3788_v26  ;;  %3532 = vmatmul.msk.bf16.gmra.mxu2 %vm1361_vm1, %v3826_v27 }
  0xc2   : > { %3520 = vmatmul.msk.bf16.gmra.mxu1 %vm1361_vm1, %v3814_v28  ;;  %3543 = vmatmul.msk.bf16.gmra.mxu3 %vm1361_vm1, %v3837_v33  ;;  %v3794_v33 = vld [vmem:[%s4205_s30 + $0x58] sm:$0xff] }
  0xd1   : > { %3495 = vmatmul.msk.bf16.gmra.mxu0 %vm1361_vm1, %v3789_v30  ;;  %3533 = vmatmul.msk.bf16.gmra.mxu2 %vm1361_vm1, %v3827_v31 }
  0xd2   : > { %3521 = vmatmul.msk.bf16.gmra.mxu1 %vm1361_vm1, %v3815_v32  ;;  %3544 = vmatmul.msk.bf16.gmra.mxu3 %vm1361_vm1, %v3838_v37 }
  0xe1   : > { %3496 = vmatmul.msk.bf16.gmra.mxu0 %vm1361_vm1, %v3790_v34  ;;  %3534 = vmatmul.msk.bf16.gmra.mxu2 %vm1361_vm1, %v3828_v35 }
  0xe2   : > { %3522 = vmatmul.msk.bf16.gmra.mxu1 %vm1361_vm1, %v3816_v36  ;;  %3545 = vmatmul.msk.bf16.gmra.mxu3 %vm1361_vm1, %v3839_v49 }
  0xee   : > { %v1564_v41 = vpop.f32.mrf.mxu0 }
  0xef   : > { %v1565_v42 = vadd.f32 %v4272_v38, %v1564_v41  ;;  %v1694_v46 = vpop.f32.mrf.mxu1 }
  0xf0   : > { %v1695_v50 = vadd.f32 %v4272_v38, %v1694_v46 }
  0xf1   : > { %1880 = vst.msk [vmem:[#allocation2] sm:$0xff] %vm1879_vm2, %v1565_v42  ;;  %3497 = vmatmul.msk.bf16.gmra.mxu0 %vm1361_vm1, %v3791_v39  ;;  %3535 = vmatmul.msk.bf16.gmra.mxu2 %vm1361_vm1, %v3829_v40 }
  0xf2   : > { %3523 = vmatmul.msk.bf16.gmra.mxu1 %vm1361_vm1, %v3817_v48  ;;  %1932 = vst.msk [vmem:[#allocation2 + $0x1a0] sm:$0xff] %vm1879_vm2, %v1695_v50  ;;  %3546 = vmatmul.msk.bf16.gmra.mxu3 %vm1361_vm1, %v3840_v3 }
  0xf4   : > { %v1754_v43 = vpop.f32.mrf.mxu2 }
  0xf5   : > { %v1755_v44 = vadd.f32 %v4272_v38, %v1754_v43  ;;  %v1809_v5 = vpop.f32.mrf.mxu3 }
  0xf6   : > { %v1566_v45 = vpop.f32.mrf.mxu0  ;;  %v1810_v6 = vadd.f32 %v4272_v38, %v1809_v5 }
  0xf7   : > { %v1567_v47 = vadd.f32 %v4272_v38, %v1566_v45  ;;  %1956 = vst.msk [vmem:[#allocation2 + $0x260] sm:$0xff] %vm1879_vm2, %v1755_v44  ;;  %v1696_v56 = vpop.f32.mrf.mxu1 }
  0xf8   : > { %v1697_v59 = vadd.f32 %v4272_v38, %v1696_v56  ;;  %1978 = vst.msk [vmem:[#allocation2 + $0x310] sm:$0xff] %vm1879_vm2, %v1810_v6  ;;  %v2006_v27 = vld [vmem:[#allocation2] sm:$0xff] }
  0xf9   : > { %1881 = vst.msk [vmem:[#allocation2 + $0x8] sm:$0xff] %vm1879_vm2, %v1567_v47 }
  0xfa   : > { %1933 = vst.msk [vmem:[#allocation2 + $0x1a8] sm:$0xff] %vm1879_vm2, %v1697_v59 }
  0xfc   : > { %v1756_v51 = vpop.f32.mrf.mxu2 }
  0xfd   : > { %v1757_v53 = vadd.f32 %v4272_v38, %v1756_v51  ;;  %v1811_v15 = vpop.f32.mrf.mxu3 }
  0xfe   : > { %v1569_v55 = vpop.f32.mrf.mxu0  ;;  %v1812_v16 = vadd.f32 %v4272_v38, %v1811_v15 }
  0xff   : > { %v1570_v57 = vadd.f32 %v4272_v38, %v1569_v55  ;;  %1957 = vst.msk [vmem:[#allocation2 + $0x268] sm:$0xff] %vm1879_vm2, %v1757_v53  ;;  %v1699_v0 = vpop.f32.mrf.mxu1 }
 0x100   : > { %v1700_v4 = vadd.f32 %v4272_v38, %v1699_v0  ;;  %1979 = vst.msk [vmem:[#allocation2 + $0x318] sm:$0xff] %vm1879_vm2, %v1812_v16  ;;  %v2007_v37 = vld [vmem:[#allocation2 + $0x8] sm:$0xff] }
 0x101   : > { %1882 = vst.msk [vmem:[#allocation2 + $0x10] sm:$0xff] %vm1879_vm2, %v1570_v57  ;;  %3498 = vmatmul.msk.bf16.gmra.mxu0 %vm1361_vm1, %v3792_v52  ;;  %3536 = vmatmul.msk.bf16.gmra.mxu2 %vm1361_vm1, %v3830_v54  ;;  %v3820_v57 = vld [vmem:[%s4205_s30 + $0x128] sm:$0xff] }
 0x102   : > { %3524 = vmatmul.msk.bf16.gmra.mxu1 %vm1361_vm1, %v3818_v2  ;;  %1934 = vst.msk [vmem:[#allocation2 + $0x1b0] sm:$0xff] %vm1879_vm2, %v1700_v4  ;;  %3547 = vmatmul.msk.bf16.gmra.mxu3 %vm1361_vm1, %v3841_v23  ;;  %v3853_v4 = vld [vmem:[%s4946_s3 + $0x18] sm:$0xff] }
 0x103   : > { %2368 = vmatpush.bf16.msrb.mxu1 %v3853_v4 }
 0x104   : > { %v1759_v60 = vpop.f32.mrf.mxu2 }
 0x105   : > { %v1760_v62 = vadd.f32 %v4272_v38, %v1759_v60  ;;  %v1814_v26 = vpop.f32.mrf.mxu3 }
 0x106   : > { %v1571_v63 = vpop.f32.mrf.mxu0  ;;  %v1815_v29 = vadd.f32 %v4272_v38, %v1814_v26 }
 0x107   : > { %v1572_v1 = vadd.f32 %v4272_v38, %v1571_v63  ;;  %1958 = vst.msk [vmem:[#allocation2 + $0x270] sm:$0xff] %vm1879_vm2, %v1760_v62  ;;  %v1701_v12 = vpop.f32.mrf.mxu1  ;;  %v3795_v63 = vld [vmem:[%s4205_s30 + $0x60] sm:$0xff] }
 0x108   : > { %v1702_v14 = vadd.f32 %v4272_v38, %v1701_v12  ;;  %v2029_v24 = vld [vmem:[#allocation2 + $0x10] sm:$0xff]  ;;  %1980 = vst.msk [vmem:[#allocation2 + $0x320] sm:$0xff] %vm1879_vm2, %v1815_v29 }
 0x109   : > { %1883 = vst.msk [vmem:[#allocation2 + $0x18] sm:$0xff] %vm1879_vm2, %v1572_v1  ;;  %v2051_v30 = vmax.f32 %v2006_v27, %v2029_v24 }
 0x10a   : > { %1935 = vst.msk [vmem:[#allocation2 + $0x1b8] sm:$0xff] %vm1879_vm2, %v1702_v14  ;;  %v3843_v14 = vld [vmem:[%s4205_s30 + $0x1e0] sm:$0xff] }
 0x10c   : > { %v1761_v7 = vpop.f32.mrf.mxu2 }
 0x10d   : > { %v1762_v9 = vadd.f32 %v4272_v38, %v1761_v7  ;;  %v1816_v46 = vpop.f32.mrf.mxu3 }
 0x10e   : > { %v1574_v11 = vpop.f32.mrf.mxu0  ;;  %v1817_v47 = vadd.f32 %v4272_v38, %v1816_v46 }
 0x10f   : > { %v1575_v13 = vadd.f32 %v4272_v38, %v1574_v11  ;;  %1959 = vst.msk [vmem:[#allocation2 + $0x278] sm:$0xff] %vm1879_vm2, %v1762_v9  ;;  %v1704_v20 = vpop.f32.mrf.mxu1  ;;  %v3852_v9 = vld [vmem:[%s4946_s3 + $0x10] sm:$0xff] }
 0x110   : > { %v1705_v25 = vadd.f32 %v4272_v38, %v1704_v20  ;;  %v2030_v32 = vld [vmem:[#allocation2 + $0x18] sm:$0xff]  ;;  %1981 = vst.msk [vmem:[#allocation2 + $0x328] sm:$0xff] %vm1879_vm2, %v1817_v47  ;;  %2369 = vmatpush.bf16.msrb.mxu1 %v3852_v9 }
 0x111   : > { %1884 = vst.msk [vmem:[#allocation2 + $0x20] sm:$0xff] %vm1879_vm2, %v1575_v13  ;;  %3499 = vmatmul.msk.bf16.gmra.mxu0 %vm1361_vm1, %v3793_v8  ;;  %3537 = vmatmul.msk.bf16.gmra.mxu2 %vm1361_vm1, %v3831_v10  ;;  %v2052_v41 = vmax.f32 %v2007_v37, %v2030_v32  ;;  %v3844_v32 = vld [vmem:[%s4205_s30 + $0x1e8] sm:$0xff] }
 0x112   : > { %3525 = vmatmul.msk.bf16.gmra.mxu1 %vm1361_vm1, %v3819_v22  ;;  %1936 = vst.msk [vmem:[#allocation2 + $0x1c0] sm:$0xff] %vm1879_vm2, %v1705_v25  ;;  %3548 = vmatmul.msk.bf16.gmra.mxu3 %vm1361_vm1, %v3842_v58 }
 0x114   : > { %v1764_v17 = vpop.f32.mrf.mxu2 }
 0x115   : > { %v1765_v18 = vadd.f32 %v4272_v38, %v1764_v17  ;;  %v1819_v60 = vpop.f32.mrf.mxu3 }
 0x116   : > { %v1576_v19 = vpop.f32.mrf.mxu0  ;;  %v1820_v61 = vadd.f32 %v4272_v38, %v1819_v60 }
 0x117   : > { %v1577_v21 = vadd.f32 %v4272_v38, %v1576_v19  ;;  %1960 = vst.msk [vmem:[#allocation2 + $0x280] sm:$0xff] %vm1879_vm2, %v1765_v18  ;;  %v1706_v39 = vpop.f32.mrf.mxu1  ;;  %v3796_v19 = vld [vmem:[%s4205_s30 + $0x68] sm:$0xff] }
 0x118   : > { %v2074_v28 = vld [vmem:[#allocation2 + $0x20] sm:$0xff]  ;;  %v1707_v45 = vadd.f32 %v4272_v38, %v1706_v39  ;;  %1982 = vst.msk [vmem:[#allocation2 + $0x330] sm:$0xff] %vm1879_vm2, %v1820_v61 }
 0x119   : > { %1885 = vst.msk [vmem:[#allocation2 + $0x28] sm:$0xff] %vm1879_vm2, %v1577_v21  ;;  %v2096_v35 = vmax.f32 %v2051_v30, %v2074_v28 }
 0x11a   : > { %1937 = vst.msk [vmem:[#allocation2 + $0x1c8] sm:$0xff] %vm1879_vm2, %v1707_v45 }
 0x11b   : > { %v2221_v44 = vpack.c.bf16 %v2096_v35, %v2096_v35 }
 0x11c   : > { %v1766_v31 = vpop.f32.mrf.mxu2 }
 0x11d   : > { %v1767_v34 = vadd.f32 %v4272_v38, %v1766_v31  ;;  %v2439_v50 = vunpack.c.l.b16 %v2221_v44  ;;  %v1821_v6 = vpop.f32.mrf.mxu3 }
 0x11e   : > { %v1579_v36 = vpop.f32.mrf.mxu0  ;;  %v1822_v7 = vadd.f32 %v4272_v38, %v1821_v6  ;;  %v3798_v6 = vld [vmem:[%s4205_s30 + $0x78] sm:$0xff] }
 0x11f   : > { %v1580_v40 = vadd.f32 %v4272_v38, %v1579_v36  ;;  %1961 = vst.msk [vmem:[#allocation2 + $0x288] sm:$0xff] %vm1879_vm2, %v1767_v34  ;;  %v1709_v54 = vpop.f32.mrf.mxu1 }
 0x120   : > { %v2075_v42 = vld [vmem:[#allocation2 + $0x28] sm:$0xff]  ;;  %v1710_v59 = vadd.f32 %v4272_v38, %v1709_v54  ;;  %1983 = vst.msk [vmem:[#allocation2 + $0x338] sm:$0xff] %vm1879_vm2, %v1822_v7 }
 0x121   : > { %1886 = vst.msk [vmem:[#allocation2 + $0x30] sm:$0xff] %vm1879_vm2, %v1580_v40  ;;  %3500 = vmatmul.msk.bf16.gmra.mxu0 %vm1361_vm1, %v3794_v33  ;;  %v2097_v43 = vmax.f32 %v2052_v41, %v2075_v42 }
 0x122   : > { %3526 = vmatmul.msk.bf16.gmra.mxu1 %vm1361_vm1, %v3820_v57  ;;  %1938 = vst.msk [vmem:[#allocation2 + $0x1d0] sm:$0xff] %vm1879_vm2, %v1710_v59  ;;  %3549 = vmatmul.msk.bf16.gmra.mxu3 %vm1361_vm1, %v3843_v14 }
 0x123   : > { %v2222_v48 = vpack.c.bf16 %v2097_v43, %v2097_v43  ;;  %v3797_v43 = vld [vmem:[%s4205_s30 + $0x70] sm:$0xff] }
 0x124   : > { %v1769_v49 = vpop.f32.mrf.mxu2 }
 0x125   : > { %v2440_v51 = vunpack.c.l.b16 %v2222_v48  ;;  %v1770_v52 = vadd.f32 %v4272_v38, %v1769_v49  ;;  %v1824_v16 = vpop.f32.mrf.mxu3 }
 0x126   : > { %v1581_v53 = vpop.f32.mrf.mxu0  ;;  %v1825_v17 = vadd.f32 %v4272_v38, %v1824_v16  ;;  %v3854_v16 = vld [vmem:[%s4946_s3 + $0x20] sm:$0xff] }
 0x127   : > { %v1582_v55 = vadd.f32 %v4272_v38, %v1581_v53  ;;  %v2459_v56 = vpack.c.b16 %v2440_v51, %v2439_v50  ;;  %1962 = vst.msk [vmem:[#allocation2 + $0x290] sm:$0xff] %vm1879_vm2, %v1770_v52  ;;  %v1711_v2 = vpop.f32.mrf.mxu1 }
 0x128   : > { %v1712_v5 = vadd.f32 %v4272_v38, %v1711_v2  ;;  %1984 = vst.msk [vmem:[#allocation2 + $0x340] sm:$0xff] %vm1879_vm2, %v1825_v17  ;;  %v2119_v36 = vld [vmem:[#allocation2 + $0x30] sm:$0xff]  ;;  %v3845_v2 = vld [vmem:[%s4205_s30 + $0x1f0] sm:$0xff] }
 0x129   : > { %1887 = vst.msk [vmem:[#allocation2 + $0x38] sm:$0xff] %vm1879_vm2, %v1582_v55  ;;  %3582 = vmatmul.msk.bf16.vlgmr.msrb.gmra.mxu2 %vm1879_vm2, %v2459_v56 }
 0x12a   : > { %1939 = vst.msk [vmem:[#allocation2 + $0x1d8] sm:$0xff] %vm1879_vm2, %v1712_v5 }
 0x12c   : > { %v1771_v62 = vpop.f32.mrf.mxu2 }
 0x12d   : > { %v1772_v0 = vadd.f32 %v4272_v38, %v1771_v62  ;;  %v1826_v25 = vpop.f32.mrf.mxu3 }
 0x12e   : > { %v1584_v1 = vpop.f32.mrf.mxu0  ;;  %v1827_v26 = vadd.f32 %v4272_v38, %v1826_v25  ;;  %v3799_v25 = vld [vmem:[%s4205_s30 + $0x80] sm:$0xff] }
 0x12f   : > { %v1585_v3 = vadd.f32 %v4272_v38, %v1584_v1  ;;  %1963 = vst.msk [vmem:[#allocation2 + $0x298] sm:$0xff] %vm1879_vm2, %v1772_v0  ;;  %v1714_v12 = vpop.f32.mrf.mxu1 }
 0x130   : > { %v1715_v15 = vadd.f32 %v4272_v38, %v1714_v12  ;;  %1985 = vst.msk [vmem:[#allocation2 + $0x348] sm:$0xff] %vm1879_vm2, %v1827_v26  ;;  %v2120_v47 = vld [vmem:[#allocation2 + $0x38] sm:$0xff]  ;;  %v3855_v12 = vld [vmem:[%s4946_s3 + $0x28] sm:$0xff] }
 0x131   : > { %1888 = vst.msk [vmem:[#allocation2 + $0x40] sm:$0xff] %vm1879_vm2, %v1585_v3  ;;  %3501 = vmatmul.msk.bf16.gmra.mxu0 %vm1361_vm1, %v3795_v63  ;;  %2601 = vmatpush.bf16.msrb.mxu3 %v3855_v12 }
 0x132   : > { %1940 = vst.msk [vmem:[#allocation2 + $0x1e0] sm:$0xff] %vm1879_vm2, %v1715_v15  ;;  %3550 = vmatmul.msk.bf16.gmra.mxu3 %vm1361_vm1, %v3844_v32 }
 0x134   : > { %v1774_v8 = vpop.f32.mrf.mxu2 }
 0x135   : > { %v1775_v10 = vadd.f32 %v4272_v38, %v1774_v8  ;;  %v1829_v35 = vpop.f32.mrf.mxu3  ;;  %2602 = vmatpush.bf16.msrb.mxu3 %v3854_v16 }
 0x136   : > { %v1586_v11 = vpop.f32.mrf.mxu0  ;;  %v1830_v39 = vadd.f32 %v4272_v38, %v1829_v35 }
 0x137   : > { %v1587_v13 = vadd.f32 %v4272_v38, %v1586_v11  ;;  %1964 = vst.msk [vmem:[#allocation2 + $0x2a0] sm:$0xff] %vm1879_vm2, %v1775_v10  ;;  %v1716_v22 = vpop.f32.mrf.mxu1 }
 0x138   : > { %v1717_v24 = vadd.f32 %v4272_v38, %v1716_v22  ;;  %v2140_v33 = vld [vmem:[#allocation2 + $0x40] sm:$0xff]  ;;  %1986 = vst.msk [vmem:[#allocation2 + $0x350] sm:$0xff] %vm1879_vm2, %v1830_v39 }
 0x139   : > { %1889 = vst.msk [vmem:[#allocation2 + $0x48] sm:$0xff] %vm1879_vm2, %v1587_v13  ;;  %v2160_v40 = vmax.f32 %v2119_v36, %v2140_v33 }
 0x13a   : > { %1941 = vst.msk [vmem:[#allocation2 + $0x1e8] sm:$0xff] %vm1879_vm2, %v1717_v24 }
 0x13c   : > { %v1776_v18 = vpop.f32.mrf.mxu2 }
 0x13d   : > { %v1777_v20 = vadd.f32 %v4272_v38, %v1776_v18  ;;  %v1831_v55 = vpop.f32.mrf.mxu3 }
 0x13e   : > { %v1589_v21 = vpop.f32.mrf.mxu0  ;;  %v1832_v56 = vadd.f32 %v4272_v38, %v1831_v55 }
 0x13f   : > { %v1590_v23 = vadd.f32 %v4272_v38, %v1589_v21  ;;  %1965 = vst.msk [vmem:[#allocation2 + $0x2a8] sm:$0xff] %vm1879_vm2, %v1777_v20  ;;  %v1719_v30 = vpop.f32.mrf.mxu1 }
 0x140   : > { %v1720_v34 = vadd.f32 %v4272_v38, %v1719_v30  ;;  %v2141_v42 = vld [vmem:[#allocation2 + $0x48] sm:$0xff]  ;;  %1987 = vst.msk [vmem:[#allocation2 + $0x358] sm:$0xff] %vm1879_vm2, %v1832_v56 }
 0x141   : > { %1890 = vst.msk [vmem:[#allocation2 + $0x50] sm:$0xff] %vm1879_vm2, %v1590_v23  ;;  %3502 = vmatmul.msk.bf16.gmra.mxu0 %vm1361_vm1, %v3796_v19  ;;  %v2161_v50 = vmax.f32 %v2120_v47, %v2141_v42 }
 0x142   : > { %1942 = vst.msk [vmem:[#allocation2 + $0x1f0] sm:$0xff] %vm1879_vm2, %v1720_v34  ;;  %3551 = vmatmul.msk.bf16.gmra.mxu3 %vm1361_vm1, %v3845_v2 }
 0x144   : > { %v1779_v27 = vpop.f32.mrf.mxu2 }
 0x145   : > { %v1780_v28 = vadd.f32 %v4272_v38, %v1779_v27  ;;  %v1834_v5 = vpop.f32.mrf.mxu3 }
 0x146   : > { %v1591_v29 = vpop.f32.mrf.mxu0  ;;  %v1835_v8 = vadd.f32 %v4272_v38, %v1834_v5 }
 0x147   : > { %v1592_v31 = vadd.f32 %v4272_v38, %v1591_v29  ;;  %1966 = vst.msk [vmem:[#allocation2 + $0x2b0] sm:$0xff] %vm1879_vm2, %v1780_v28  ;;  %v1721_v48 = vpop.f32.mrf.mxu1 }
 0x148   : > { %v2181_v37 = vld [vmem:[#allocation2 + $0x50] sm:$0xff]  ;;  %v1722_v54 = vadd.f32 %v4272_v38, %v1721_v48  ;;  %1988 = vst.msk [vmem:[#allocation2 + $0x360] sm:$0xff] %vm1879_vm2, %v1835_v8 }
 0x149   : > { %1891 = vst.msk [vmem:[#allocation2 + $0x58] sm:$0xff] %vm1879_vm2, %v1592_v31  ;;  %v2201_v45 = vmax.f32 %v2160_v40, %v2181_v37  ;;  %v3800_v48 = vld [vmem:[%s4205_s30 + $0x88] sm:$0xff] }
 0x14a   : > { %1943 = vst.msk [vmem:[#allocation2 + $0x1f8] sm:$0xff] %vm1879_vm2, %v1722_v54 }
 0x14b   : > { %v2245_v53 = vpack.c.bf16 %v2201_v45, %v2201_v45 }
 0x14c   : > { %v1781_v41 = vpop.f32.mrf.mxu2 }
 0x14d   : > { %v1782_v44 = vadd.f32 %v4272_v38, %v1781_v41  ;;  %v2290_v59 = vunpack.c.l.b16 %v2245_v53  ;;  %v1836_v15 = vpop.f32.mrf.mxu3 }
 0x14e   : > { %v1594_v46 = vpop.f32.mrf.mxu0  ;;  %v1837_v18 = vadd.f32 %v4272_v38, %v1836_v15 }
 0x14f   : > { %v1595_v49 = vadd.f32 %v4272_v38, %v1594_v46  ;;  %1967 = vst.msk [vmem:[#allocation2 + $0x2b8] sm:$0xff] %vm1879_vm2, %v1782_v44  ;;  %v1724_v63 = vpop.f32.mrf.mxu1 }
 0x150   : > { %v2182_v51 = vld [vmem:[#allocation2 + $0x58] sm:$0xff]  ;;  %v1725_v3 = vadd.f32 %v4272_v38, %v1724_v63  ;;  %1989 = vst.msk [vmem:[#allocation2 + $0x368] sm:$0xff] %vm1879_vm2, %v1837_v18 }
 0x151   : > { %1892 = vst.msk [vmem:[#allocation2 + $0x60] sm:$0xff] %vm1879_vm2, %v1595_v49  ;;  %3503 = vmatmul.msk.bf16.gmra.mxu0 %vm1361_vm1, %v3797_v43  ;;  %v2202_v52 = vmax.f32 %v2161_v50, %v2182_v51 }
 0x152   : > { %1944 = vst.msk [vmem:[#allocation2 + $0x200] sm:$0xff] %vm1879_vm2, %v1725_v3 }
 0x153   : > { %v2246_v57 = vpack.c.bf16 %v2202_v52, %v2202_v52 }
 0x154   : > { %v1784_v58 = vpop.f32.mrf.mxu2 }
 0x155   : > { %v2291_v60 = vunpack.c.l.b16 %v2246_v57  ;;  %v1785_v61 = vadd.f32 %v4272_v38, %v1784_v58  ;;  %v1839_v24 = vpop.f32.mrf.mxu3 }
 0x156   : > { %v1596_v62 = vpop.f32.mrf.mxu0  ;;  %v1840_v27 = vadd.f32 %v4272_v38, %v1839_v24 }
 0x157   : > { %v1597_v0 = vadd.f32 %v4272_v38, %v1596_v62  ;;  %v2310_v1 = vpack.c.b16 %v2291_v60, %v2290_v59  ;;  %1968 = vst.msk [vmem:[#allocation2 + $0x2c0] sm:$0xff] %vm1879_vm2, %v1785_v61  ;;  %v1726_v10 = vpop.f32.mrf.mxu1 }
 0x158   : > { %v1727_v13 = vadd.f32 %v4272_v38, %v1726_v10  ;;  %1990 = vst.msk [vmem:[#allocation2 + $0x370] sm:$0xff] %vm1879_vm2, %v1840_v27  ;;  %v2008_v42 = vld [vmem:[#allocation2 + $0x60] sm:$0xff] }
 0x159   : > { %1893 = vst.msk [vmem:[#allocation2 + $0x68] sm:$0xff] %vm1879_vm2, %v1597_v0  ;;  %3564 = vmatmul.msk.bf16.vlgmr.msrb.gmra.mxu1 %vm1879_vm2, %v2310_v1 }
 0x15a   : > { %1945 = vst.msk [vmem:[#allocation2 + $0x208] sm:$0xff] %vm1879_vm2, %v1727_v13 }
 0x15c   : > { %v1786_v4 = vpop.f32.mrf.mxu2 }
 0x15d   : > { %v1787_v7 = vadd.f32 %v4272_v38, %v1786_v4  ;;  %v1841_v33 = vpop.f32.mrf.mxu3 }
 0x15e   : > { %v1599_v9 = vpop.f32.mrf.mxu0  ;;  %v1842_v35 = vadd.f32 %v4272_v38, %v1841_v33 }
 0x15f   : > { %v1600_v11 = vadd.f32 %v4272_v38, %v1599_v9  ;;  %1969 = vst.msk [vmem:[#allocation2 + $0x2c8] sm:$0xff] %vm1879_vm2, %v1787_v7  ;;  %v1729_v20 = vpop.f32.mrf.mxu1 }
 0x160   : > { %v1730_v22 = vadd.f32 %v4272_v38, %v1729_v20  ;;  %1991 = vst.msk [vmem:[#allocation2 + $0x378] sm:$0xff] %vm1879_vm2, %v1842_v35  ;;  %v2009_v53 = vld [vmem:[#allocation2 + $0x68] sm:$0xff] }
 0x161   : > { %1894 = vst.msk [vmem:[#allocation2 + $0x70] sm:$0xff] %vm1879_vm2, %v1600_v11  ;;  %3504 = vmatmul.msk.bf16.gmra.mxu0 %vm1361_vm1, %v3798_v6  ;;  %v3801_v11 = vld [vmem:[%s4205_s30 + $0x90] sm:$0xff] }
 0x162   : > { %1946 = vst.msk [vmem:[#allocation2 + $0x210] sm:$0xff] %vm1879_vm2, %v1730_v22 }
 0x164   : > { %v1789_v14 = vpop.f32.mrf.mxu2 }
 0x165   : > { %v1790_v17 = vadd.f32 %v4272_v38, %v1789_v14  ;;  %v1844_v47 = vpop.f32.mrf.mxu3 }
 0x166   : > { %v1601_v19 = vpop.f32.mrf.mxu0  ;;  %v1845_v51 = vadd.f32 %v4272_v38, %v1844_v47  ;;  %v3803_v47 = vld [vmem:[%s4205_s30 + $0xa0] sm:$0xff] }
 0x167   : > { %v1602_v21 = vadd.f32 %v4272_v38, %v1601_v19  ;;  %1970 = vst.msk [vmem:[#allocation2 + $0x2d0] sm:$0xff] %vm1879_vm2, %v1790_v17  ;;  %v1731_v29 = vpop.f32.mrf.mxu1 }
 0x168   : > { %v1732_v31 = vadd.f32 %v4272_v38, %v1731_v29  ;;  %v2031_v40 = vld [vmem:[#allocation2 + $0x70] sm:$0xff]  ;;  %1992 = vst.msk [vmem:[#allocation2 + $0x380] sm:$0xff] %vm1879_vm2, %v1845_v51 }
 0x169   : > { %1895 = vst.msk [vmem:[#allocation2 + $0x78] sm:$0xff] %vm1879_vm2, %v1602_v21  ;;  %v2053_v44 = vmax.f32 %v2008_v42, %v2031_v40 }
 0x16a   : > { %1947 = vst.msk [vmem:[#allocation2 + $0x218] sm:$0xff] %vm1879_vm2, %v1732_v31 }
 0x16c   : > { %v1791_v23 = vpop.f32.mrf.mxu2 }
 0x16d   : > { %v1792_v26 = vadd.f32 %v4272_v38, %v1791_v23  ;;  %v1846_v63 = vpop.f32.mrf.mxu3 }
 0x16e   : > { %v1604_v28 = vpop.f32.mrf.mxu0  ;;  %v1847_v3 = vadd.f32 %v4272_v38, %v1846_v63 }
 0x16f   : > { %v1605_v30 = vadd.f32 %v4272_v38, %v1604_v28  ;;  %1971 = vst.msk [vmem:[#allocation2 + $0x2d8] sm:$0xff] %vm1879_vm2, %v1792_v26  ;;  %v1734_v37 = vpop.f32.mrf.mxu1  ;;  %v3802_v28 = vld [vmem:[%s4205_s30 + $0x98] sm:$0xff] }
 0x170   : > { %v1735_v41 = vadd.f32 %v4272_v38, %v1734_v37  ;;  %v2032_v46 = vld [vmem:[#allocation2 + $0x78] sm:$0xff]  ;;  %1993 = vst.msk [vmem:[#allocation2 + $0x388] sm:$0xff] %vm1879_vm2, %v1847_v3 }
 0x171   : > { %1896 = vst.msk [vmem:[#allocation2 + $0x80] sm:$0xff] %vm1879_vm2, %v1605_v30  ;;  %3505 = vmatmul.msk.bf16.gmra.mxu0 %vm1361_vm1, %v3799_v25  ;;  %v2054_v56 = vmax.f32 %v2009_v53, %v2032_v46 }
 0x172   : > { %1948 = vst.msk [vmem:[#allocation2 + $0x220] sm:$0xff] %vm1879_vm2, %v1735_v41 }
 0x174   : > { %v1794_v32 = vpop.f32.mrf.mxu2 }
 0x175   : > { %v1795_v34 = vadd.f32 %v4272_v38, %v1794_v32  ;;  %v1849_v10 = vpop.f32.mrf.mxu3 }
 0x176   : > { %v1606_v36 = vpop.f32.mrf.mxu0  ;;  %v1850_v13 = vadd.f32 %v4272_v38, %v1849_v10 }
 0x177   : > { %v1607_v39 = vadd.f32 %v4272_v38, %v1606_v36  ;;  %1972 = vst.msk [vmem:[#allocation2 + $0x2e0] sm:$0xff] %vm1879_vm2, %v1795_v34  ;;  %v1736_v54 = vpop.f32.mrf.mxu1 }
 0x178   : > { %v2076_v43 = vld [vmem:[#allocation2 + $0x80] sm:$0xff]  ;;  %v1737_v60 = vadd.f32 %v4272_v38, %v1736_v54  ;;  %1994 = vst.msk [vmem:[#allocation2 + $0x390] sm:$0xff] %vm1879_vm2, %v1850_v13 }
 0x179   : > { %1897 = vst.msk [vmem:[#allocation2 + $0x88] sm:$0xff] %vm1879_vm2, %v1607_v39  ;;  %v2098_v50 = vmax.f32 %v2053_v44, %v2076_v43  ;;  %v3805_v13 = vld [vmem:[%s4205_s30 + $0xb0] sm:$0xff] }
 0x17a   : > { %1949 = vst.msk [vmem:[#allocation2 + $0x228] sm:$0xff] %vm1879_vm2, %v1737_v60 }
 0x17b   : > { %v2223_v59 = vpack.c.bf16 %v2098_v50, %v2098_v50 }
 0x17c   : > { %v1796_v45 = vpop.f32.mrf.mxu2 }
 0x17d   : > { %v1797_v49 = vadd.f32 %v4272_v38, %v1796_v45  ;;  %v2441_v0 = vunpack.c.l.b16 %v2223_v59  ;;  %v1851_v19 = vpop.f32.mrf.mxu3 }
 0x17e   : > { %v1609_v52 = vpop.f32.mrf.mxu0  ;;  %v1852_v21 = vadd.f32 %v4272_v38, %v1851_v19 }
 0x17f   : > { %v1610_v55 = vadd.f32 %v4272_v38, %v1609_v52  ;;  %1973 = vst.msk [vmem:[#allocation2 + $0x2e8] sm:$0xff] %vm1879_vm2, %v1797_v49  ;;  %v1739_v5 = vpop.f32.mrf.mxu1 }
 0x180   : > { %v2077_v57 = vld [vmem:[#allocation2 + $0x88] sm:$0xff]  ;;  %v1740_v8 = vadd.f32 %v4272_v38, %v1739_v5  ;;  %1995 = vst.msk [vmem:[#allocation2 + $0x398] sm:$0xff] %vm1879_vm2, %v1852_v21 }
 0x181   : > { %1898 = vst.msk [vmem:[#allocation2 + $0x90] sm:$0xff] %vm1879_vm2, %v1610_v55  ;;  %3506 = vmatmul.msk.bf16.gmra.mxu0 %vm1361_vm1, %v3800_v48  ;;  %v2099_v58 = vmax.f32 %v2054_v56, %v2077_v57 }
 0x182   : > { %1950 = vst.msk [vmem:[#allocation2 + $0x230] sm:$0xff] %vm1879_vm2, %v1740_v8 }
 0x183   : > { %v2224_v61 = vpack.c.bf16 %v2099_v58, %v2099_v58 }
 0x184   : > { %v1799_v62 = vpop.f32.mrf.mxu2 }
 0x185   : > { %v2442_v1 = vunpack.c.l.b16 %v2224_v61  ;;  %v1800_v2 = vadd.f32 %v4272_v38, %v1799_v62  ;;  %v1854_v27 = vpop.f32.mrf.mxu3 }
 0x186   : > { %v1611_v4 = vpop.f32.mrf.mxu0  ;;  %v1855_v30 = vadd.f32 %v4272_v38, %v1854_v27  ;;  %v3806_v27 = vld [vmem:[%s4205_s30 + $0xb8] sm:$0xff] }
 0x187   : > { %v1612_v6 = vadd.f32 %v4272_v38, %v1611_v4  ;;  %v2460_v7 = vpack.c.b16 %v2442_v1, %v2441_v0  ;;  %1974 = vst.msk [vmem:[#allocation2 + $0x2f0] sm:$0xff] %vm1879_vm2, %v1800_v2  ;;  %v1741_v15 = vpop.f32.mrf.mxu1  ;;  %v3804_v4 = vld [vmem:[%s4205_s30 + $0xa8] sm:$0xff] }
 0x188   : > { %v1742_v17 = vadd.f32 %v4272_v38, %v1741_v15  ;;  %1996 = vst.msk [vmem:[#allocation2 + $0x3a0] sm:$0xff] %vm1879_vm2, %v1855_v30  ;;  %v2121_v43 = vld [vmem:[#allocation2 + $0x90] sm:$0xff] }
 0x189   : > { %1899 = vst.msk [vmem:[#allocation2 + $0x98] sm:$0xff] %vm1879_vm2, %v1612_v6  ;;  %3583 = vmatmul.msk.bf16.gmra.mxu2 %vm1879_vm2, %v2460_v7  ;;  %3604 = vmatmul.msk.bf16.vlgmr.msrb.gmra.mxu3 %vm1879_vm2, %v2460_v7 }
 0x18a   : > { %1951 = vst.msk [vmem:[#allocation2 + $0x238] sm:$0xff] %vm1879_vm2, %v1742_v17 }
 0x18c   : > { %v1801_v9 = vpop.f32.mrf.mxu2 }
 0x18d   : > { %v1802_v12 = vadd.f32 %v4272_v38, %v1801_v9  ;;  %v1856_v35 = vpop.f32.mrf.mxu3 }
 0x18e   : > { %v1614_v14 = vpop.f32.mrf.mxu0  ;;  %v1857_v36 = vadd.f32 %v4272_v38, %v1856_v35 }
 0x18f   : > { %v1615_v16 = vadd.f32 %v4272_v38, %v1614_v14  ;;  %1975 = vst.msk [vmem:[#allocation2 + $0x2f8] sm:$0xff] %vm1879_vm2, %v1802_v12  ;;  %v1744_v23 = vpop.f32.mrf.mxu1 }
 0x190   : > { %v1745_v25 = vadd.f32 %v4272_v38, %v1744_v23  ;;  %1997 = vst.msk [vmem:[#allocation2 + $0x3a8] sm:$0xff] %vm1879_vm2, %v1857_v36  ;;  %v2122_v51 = vld [vmem:[#allocation2 + $0x98] sm:$0xff] }
 0x191   : > { %1900 = vst.msk [vmem:[#allocation2 + $0xa0] sm:$0xff] %vm1879_vm2, %v1615_v16  ;;  %3507 = vmatmul.msk.bf16.gmra.mxu0 %vm1361_vm1, %v3801_v11 }
 0x192   : > { %1952 = vst.msk [vmem:[#allocation2 + $0x240] sm:$0xff] %vm1879_vm2, %v1745_v25 }
 0x194   : > { %v1804_v18 = vpop.f32.mrf.mxu2 }
 0x195   : > { %v1805_v20 = vadd.f32 %v4272_v38, %v1804_v18  ;;  %v1859_v49 = vpop.f32.mrf.mxu3 }
 0x196   : > { %v1616_v22 = vpop.f32.mrf.mxu0  ;;  %v1860_v52 = vadd.f32 %v4272_v38, %v1859_v49 }
 0x197   : > { %v1617_v24 = vadd.f32 %v4272_v38, %v1616_v22  ;;  %1976 = vst.msk [vmem:[#allocation2 + $0x300] sm:$0xff] %vm1879_vm2, %v1805_v20  ;;  %v1746_v32 = vpop.f32.mrf.mxu1 }
 0x198   : > { %v1747_v34 = vadd.f32 %v4272_v38, %v1746_v32  ;;  %v2142_v41 = vld [vmem:[#allocation2 + $0xa0] sm:$0xff]  ;;  %1998 = vst.msk [vmem:[#allocation2 + $0x3b0] sm:$0xff] %vm1879_vm2, %v1860_v52  ;;  %v3808_v52 = vld [vmem:[%s4205_s30 + $0xc8] sm:$0xff] }
 0x199   : > { %1901 = vst.msk [vmem:[#allocation2 + $0xa8] sm:$0xff] %vm1879_vm2, %v1617_v24  ;;  %v2162_v45 = vmax.f32 %v2121_v43, %v2142_v41 }
 0x19a   : > { %1953 = vst.msk [vmem:[#allocation2 + $0x248] sm:$0xff] %vm1879_vm2, %v1747_v34 }
 0x19c   : > { %v1806_v26 = vpop.f32.mrf.mxu2 }
 0x19d   : > { %v1807_v29 = vadd.f32 %v4272_v38, %v1806_v26  ;;  %v1861_v63 = vpop.f32.mrf.mxu3 }
 0x19e   : > { %v1619_v31 = vpop.f32.mrf.mxu0  ;;  %v1862_v1 = vadd.f32 %v4272_v38, %v1861_v63 }
 0x19f   : > { %v1620_v33 = vadd.f32 %v4272_v38, %v1619_v31  ;;  %1977 = vst.msk [vmem:[#allocation2 + $0x308] sm:$0xff] %vm1879_vm2, %v1807_v29  ;;  %v1749_v39 = vpop.f32.mrf.mxu1 }
 0x1a0   : > { %v1750_v42 = vadd.f32 %v4272_v38, %v1749_v39  ;;  %v2143_v46 = vld [vmem:[#allocation2 + $0xa8] sm:$0xff]  ;;  %1999 = vst.msk [vmem:[#allocation2 + $0x3b8] sm:$0xff] %vm1879_vm2, %v1862_v1 }
 0x1a1   : > { %1902 = vst.msk [vmem:[#allocation2 + $0xb0] sm:$0xff] %vm1879_vm2, %v1620_v33  ;;  %3508 = vmatmul.msk.bf16.gmra.mxu0 %vm1361_vm1, %v3802_v28  ;;  %v2163_v54 = vmax.f32 %v2122_v51, %v2143_v46 }
 0x1a2   : > { %1954 = vst.msk [vmem:[#allocation2 + $0x250] sm:$0xff] %vm1879_vm2, %v1750_v42 }
 0x1a5   : > { %v1864_v5 = vpop.f32.mrf.mxu3 }
 0x1a6   : > { %v1621_v37 = vpop.f32.mrf.mxu0  ;;  %v1865_v7 = vadd.f32 %v4272_v38, %v1864_v5 }
 0x1a7   : > { %v1622_v40 = vadd.f32 %v4272_v38, %v1621_v37  ;;  %v1751_v56 = vpop.f32.mrf.mxu1 }
 0x1a8   : > { %v2183_v44 = vld [vmem:[#allocation2 + $0xb0] sm:$0xff]  ;;  %v1752_v59 = vadd.f32 %v4272_v38, %v1751_v56  ;;  %2000 = vst.msk [vmem:[#allocation2 + $0x3c0] sm:$0xff] %vm1879_vm2, %v1865_v7 }
 0x1a9   : > { %1903 = vst.msk [vmem:[#allocation2 + $0xb8] sm:$0xff] %vm1879_vm2, %v1622_v40  ;;  %v2203_v48 = vmax.f32 %v2162_v45, %v2183_v44 }
 0x1aa   : > { %1955 = vst.msk [vmem:[#allocation2 + $0x258] sm:$0xff] %vm1879_vm2, %v1752_v59 }
 0x1ab   : > { %v2247_v58 = vpack.c.bf16 %v2203_v48, %v2203_v48 }
 0x1ad   : > { %v2292_v61 = vunpack.c.l.b16 %v2247_v58  ;;  %v1866_v9 = vpop.f32.mrf.mxu3 }
 0x1ae   : > { %v1624_v50 = vpop.f32.mrf.mxu0  ;;  %v1867_v11 = vadd.f32 %v4272_v38, %v1866_v9 }
 0x1af   : > { %v1625_v53 = vadd.f32 %v4272_v38, %v1624_v50 }
 0x1b0   : > { %v2184_v55 = vld [vmem:[#allocation2 + $0xb8] sm:$0xff]  ;;  %2001 = vst.msk [vmem:[#allocation2 + $0x3c8] sm:$0xff] %vm1879_vm2, %v1867_v11 }
 0x1b1   : > { %1904 = vst.msk [vmem:[#allocation2 + $0xc0] sm:$0xff] %vm1879_vm2, %v1625_v53  ;;  %3509 = vmatmul.msk.bf16.gmra.mxu0 %vm1361_vm1, %v3803_v47  ;;  %v2204_v57 = vmax.f32 %v2163_v54, %v2184_v55  ;;  %v3807_v47 = vld [vmem:[%s4205_s30 + $0xc0] sm:$0xff] }
 0x1b3   : > { %v2248_v60 = vpack.c.bf16 %v2204_v57, %v2204_v57 }
 0x1b5   : > { %v2293_v62 = vunpack.c.l.b16 %v2248_v60  ;;  %v1869_v14 = vpop.f32.mrf.mxu3 }
 0x1b6   : > { %v1626_v0 = vpop.f32.mrf.mxu0  ;;  %v1870_v16 = vadd.f32 %v4272_v38, %v1869_v14 }
 0x1b7   : > { %v1627_v2 = vadd.f32 %v4272_v38, %v1626_v0  ;;  %v2311_v3 = vpack.c.b16 %v2293_v62, %v2292_v61 }
 0x1b8   : > { %2002 = vst.msk [vmem:[#allocation2 + $0x3d0] sm:$0xff] %vm1879_vm2, %v1870_v16  ;;  %v2010_v23 = vld [vmem:[#allocation2 + $0xc0] sm:$0xff] }
 0x1b9   : > { %1905 = vst.msk [vmem:[#allocation2 + $0xc8] sm:$0xff] %vm1879_vm2, %v1627_v2  ;;  %3565 = vmatmul.msk.bf16.gmra.mxu1 %vm1879_vm2, %v2311_v3 }
 0x1bd   : > { %v1871_v18 = vpop.f32.mrf.mxu3 }
 0x1be   : > { %v1629_v6 = vpop.f32.mrf.mxu0  ;;  %v1872_v20 = vadd.f32 %v4272_v38, %v1871_v18 }
 0x1bf   : > { %v1630_v8 = vadd.f32 %v4272_v38, %v1629_v6 }
 0x1c0   : > { %2003 = vst.msk [vmem:[#allocation2 + $0x3d8] sm:$0xff] %vm1879_vm2, %v1872_v20  ;;  %v2011_v31 = vld [vmem:[#allocation2 + $0xc8] sm:$0xff] }
 0x1c1   : > { %1906 = vst.msk [vmem:[#allocation2 + $0xd0] sm:$0xff] %vm1879_vm2, %v1630_v8  ;;  %3510 = vmatmul.msk.bf16.gmra.mxu0 %vm1361_vm1, %v3804_v4 }
 0x1c5   : > { %v1874_v29 = vpop.f32.mrf.mxu3 }
 0x1c6   : > { %v1631_v10 = vpop.f32.mrf.mxu0  ;;  %v1875_v32 = vadd.f32 %v4272_v38, %v1874_v29 }
 0x1c7   : > { %v1632_v12 = vadd.f32 %v4272_v38, %v1631_v10 }
 0x1c8   : > { %v2033_v22 = vld [vmem:[#allocation2 + $0xd0] sm:$0xff]  ;;  %2004 = vst.msk [vmem:[#allocation2 + $0x3e0] sm:$0xff] %vm1879_vm2, %v1875_v32 }
 0x1c9   : > { %1907 = vst.msk [vmem:[#allocation2 + $0xd8] sm:$0xff] %vm1879_vm2, %v1632_v12  ;;  %v2055_v25 = vmax.f32 %v2010_v23, %v2033_v22 }
 0x1cd   : > { %v1876_v42 = vpop.f32.mrf.mxu3 }
 0x1ce   : > { %v1634_v15 = vpop.f32.mrf.mxu0  ;;  %v1877_v44 = vadd.f32 %v4272_v38, %v1876_v42 }
 0x1cf   : > { %v1635_v17 = vadd.f32 %v4272_v38, %v1634_v15 }
 0x1d0   : > { %v2034_v26 = vld [vmem:[#allocation2 + $0xd8] sm:$0xff]  ;;  %2005 = vst.msk [vmem:[#allocation2 + $0x3e8] sm:$0xff] %vm1879_vm2, %v1877_v44 }
 0x1d1   : > { %1908 = vst.msk [vmem:[#allocation2 + $0xe0] sm:$0xff] %vm1879_vm2, %v1635_v17  ;;  %3511 = vmatmul.msk.bf16.gmra.mxu0 %vm1361_vm1, %v3805_v13  ;;  %v2056_v34 = vmax.f32 %v2011_v31, %v2034_v26  ;;  %v4591_v13 = vld [vmem:[%s4945_s2] ss:$0 sm:$0xff] }
 0x1d6   : > { %v1636_v19 = vpop.f32.mrf.mxu0 }
 0x1d7   : > { %v1637_v21 = vadd.f32 %v4272_v38, %v1636_v19 }
 0x1d8   : > { %v2078_v24 = vld [vmem:[#allocation2 + $0xe0] sm:$0xff] }
 0x1d9   : > { %1909 = vst.msk [vmem:[#allocation2 + $0xe8] sm:$0xff] %vm1879_vm2, %v1637_v21  ;;  %v2100_v28 = vmax.f32 %v2055_v25, %v2078_v24 }
 0x1db   : > { %v2225_v37 = vpack.c.bf16 %v2100_v28, %v2100_v28 }
 0x1dd   : > { %v2443_v40 = vunpack.c.l.b16 %v2225_v37 }
 0x1de   : > { %v1639_v30 = vpop.f32.mrf.mxu0 }
 0x1df   : > { %v1640_v33 = vadd.f32 %v4272_v38, %v1639_v30 }
 0x1e0   : > { %v2079_v35 = vld [vmem:[#allocation2 + $0xe8] sm:$0xff] }
 0x1e1   : > { %1910 = vst.msk [vmem:[#allocation2 + $0xf0] sm:$0xff] %vm1879_vm2, %v1640_v33  ;;  %3512 = vmatmul.msk.bf16.gmra.mxu0 %vm1361_vm1, %v3806_v27  ;;  %v2101_v36 = vmax.f32 %v2056_v34, %v2079_v35 }
 0x1e3   : > { %v2226_v39 = vpack.c.bf16 %v2101_v36, %v2101_v36 }
 0x1e5   : > { %v2444_v41 = vunpack.c.l.b16 %v2226_v39 }
 0x1e6   : > { %v1641_v43 = vpop.f32.mrf.mxu0 }
 0x1e7   : > { %v1642_v45 = vadd.f32 %v4272_v38, %v1641_v43  ;;  %v2461_v46 = vpack.c.b16 %v2444_v41, %v2443_v40 }
 0x1e8   : > { %v2123_v58 = vld [vmem:[#allocation2 + $0xf0] sm:$0xff] }
 0x1e9   : > { %1911 = vst.msk [vmem:[#allocation2 + $0xf8] sm:$0xff] %vm1879_vm2, %v1642_v45  ;;  %3584 = vmatmul.msk.bf16.gmra.mxu2 %vm1879_vm2, %v2461_v46  ;;  %3605 = vmatmul.msk.bf16.gmra.mxu3 %vm1879_vm2, %v2461_v46 }
 0x1ee   : > { %v1644_v48 = vpop.f32.mrf.mxu0 }
 0x1ef   : > { %v1645_v49 = vadd.f32 %v4272_v38, %v1644_v48 }
 0x1f0   : > { %v2124_v0 = vld [vmem:[#allocation2 + $0xf8] sm:$0xff] }
 0x1f1   : > { %1912 = vst.msk [vmem:[#allocation2 + $0x100] sm:$0xff] %vm1879_vm2, %v1645_v49  ;;  %3513 = vmatmul.msk.bf16.gmra.mxu0 %vm1361_vm1, %v3807_v47 }
 0x1f6   : > { %v1646_v50 = vpop.f32.mrf.mxu0 }
 0x1f7   : > { %v1647_v51 = vadd.f32 %v4272_v38, %v1646_v50 }
 0x1f8   : > { %v2144_v57 = vld [vmem:[#allocation2 + $0x100] sm:$0xff] }
 0x1f9   : > { %1913 = vst.msk [vmem:[#allocation2 + $0x108] sm:$0xff] %vm1879_vm2, %v1647_v51  ;;  %v2164_v60 = vmax.f32 %v2123_v58, %v2144_v57 }
 0x1fe   : > { %v1649_v53 = vpop.f32.mrf.mxu0 }
 0x1ff   : > { %v1650_v54 = vadd.f32 %v4272_v38, %v1649_v53 }
 0x200   : > { %v2145_v61 = vld [vmem:[#allocation2 + $0x108] sm:$0xff] }
 0x201   : > { %1914 = vst.msk [vmem:[#allocation2 + $0x110] sm:$0xff] %vm1879_vm2, %v1650_v54  ;;  %3514 = vmatmul.msk.bf16.gmra.mxu0 %vm1361_vm1, %v3808_v52  ;;  %v2165_v2 = vmax.f32 %v2124_v0, %v2145_v61  ;;  %v2148_v0 = vld [vmem:[#allocation2 + $0x1c0] sm:$0xff] }
 0x206   : > { %v1651_v55 = vpop.f32.mrf.mxu0 }
 0x207   : > { %v1652_v56 = vadd.f32 %v4272_v38, %v1651_v55 }
 0x208   : > { %v2185_v59 = vld [vmem:[#allocation2 + $0x110] sm:$0xff] }
 0x209   : > { %1915 = vst.msk [vmem:[#allocation2 + $0x118] sm:$0xff] %vm1879_vm2, %v1652_v56  ;;  %v2205_v62 = vmax.f32 %v2164_v60, %v2185_v59 }
 0x20b   : > { %v2249_v5 = vpack.c.bf16 %v2205_v62, %v2205_v62  ;;  %v2127_v62 = vld [vmem:[#allocation2 + $0x1b0] sm:$0xff] }
 0x20d   : > { %v2294_v7 = vunpack.c.l.b16 %v2249_v5 }
 0x20e   : > { %v1654_v63 = vpop.f32.mrf.mxu0 }
 0x20f   : > { %v1655_v1 = vadd.f32 %v4272_v38, %v1654_v63  ;;  %v2128_v63 = vld [vmem:[#allocation2 + $0x1b8] sm:$0xff] }
 0x210   : > { %v2186_v3 = vld [vmem:[#allocation2 + $0x118] sm:$0xff] }
 0x211   : > { %1916 = vst.msk [vmem:[#allocation2 + $0x120] sm:$0xff] %vm1879_vm2, %v1655_v1  ;;  %v2206_v4 = vmax.f32 %v2165_v2, %v2186_v3  ;;  %v2149_v1 = vld [vmem:[#allocation2 + $0x1c8] sm:$0xff] }
 0x213   : > { %v2250_v6 = vpack.c.bf16 %v2206_v4, %v2206_v4 }
 0x215   : > { %v2295_v8 = vunpack.c.l.b16 %v2250_v6 }
 0x216   : > { %v1656_v9 = vpop.f32.mrf.mxu0 }
 0x217   : > { %v1657_v10 = vadd.f32 %v4272_v38, %v1656_v9  ;;  %v2312_v11 = vpack.c.b16 %v2295_v8, %v2294_v7  ;;  %v2168_v7 = vmax.f32 %v2127_v62, %v2148_v0  ;;  %v2169_v8 = vmax.f32 %v2128_v63, %v2149_v1  ;;  %v2189_v9 = vld [vmem:[#allocation2 + $0x1d0] sm:$0xff]  ;;  %v2194_v62 = vld [vmem:[#allocation2 + $0x298] sm:$0xff] }
 0x218   : > { %v2012_v21 = vld [vmem:[#allocation2 + $0x120] sm:$0xff] }
 0x219   : > { %1917 = vst.msk [vmem:[#allocation2 + $0x128] sm:$0xff] %vm1879_vm2, %v1657_v10  ;;  %3566 = vmatmul.msk.bf16.gmra.mxu1 %vm1879_vm2, %v2312_v11  ;;  %v2190_v10 = vld [vmem:[#allocation2 + $0x1d8] sm:$0xff]  ;;  %v2209_v11 = vmax.f32 %v2168_v7, %v2189_v9 }
 0x21e   : > { %v1659_v12 = vpop.f32.mrf.mxu0 }
 0x21f   : > { %v1660_v14 = vadd.f32 %v4591_v13, %v1659_v12  ;;  %v2210_v12 = vmax.f32 %v2169_v8, %v2190_v10 }
 0x220   : > { %v2013_v27 = vld [vmem:[#allocation2 + $0x128] sm:$0xff] }
 0x221   : > { %1918 = vst.msk [vmem:[#allocation2 + $0x130] sm:$0xff] %vm1879_vm2, %v1660_v14 }
 0x226   : > { %v1661_v15 = vpop.f32.mrf.mxu0 }
 0x227   : > { %v1662_v16 = vadd.f32 %v4591_v13, %v1661_v15 }
 0x228   : > { %v2035_v20 = vld [vmem:[#allocation2 + $0x130] sm:$0xff] }
 0x229   : > { %1919 = vst.msk [vmem:[#allocation2 + $0x138] sm:$0xff] %vm1879_vm2, %v1662_v16  ;;  %v2057_v23 = vmax.f32 %v2012_v21, %v2035_v20  ;;  %v2253_v16 = vpack.c.bf16 %v2209_v11, %v2209_v11  ;;  %v2130_v20 = vld [vmem:[#allocation2 + $0x218] sm:$0xff]  ;;  %v2150_v21 = vld [vmem:[#allocation2 + $0x220] sm:$0xff] }
 0x22e   : > { %v1664_v38 = vpop.f32.mrf.mxu0 }
 0x22f   : > { %v1665_v17 = vadd.f32 %v4591_v13, %v1664_v38  ;;  %v2254_v38 = vpack.c.bf16 %v2210_v12, %v2210_v12 }
 0x230   : > { %v2036_v24 = vld [vmem:[#allocation2 + $0x138] sm:$0xff] }
 0x231   : > { %1920 = vst.msk [vmem:[#allocation2 + $0x140] sm:$0xff] %vm1879_vm2, %v1665_v17  ;;  %v2058_v29 = vmax.f32 %v2013_v27, %v2036_v24  ;;  %v2298_v17 = vunpack.c.l.b16 %v2253_v16  ;;  %v2134_v16 = vld [vmem:[#allocation2 + $0x2d8] sm:$0xff] }
 0x236   : > { %v1666_v18 = vpop.f32.mrf.mxu0 }
 0x237   : > { %v1667_v19 = vadd.f32 %v4591_v13, %v1666_v18  ;;  %v2299_v18 = vunpack.c.l.b16 %v2254_v38  ;;  %v2154_v38 = vld [vmem:[#allocation2 + $0x2e0] sm:$0xff] }
 0x238   : > { %v2080_v22 = vld [vmem:[#allocation2 + $0x140] sm:$0xff] }
 0x239   : > { %1921 = vst.msk [vmem:[#allocation2 + $0x148] sm:$0xff] %vm1879_vm2, %v1667_v19  ;;  %v2102_v25 = vmax.f32 %v2057_v23, %v2080_v22  ;;  %v2129_v19 = vld [vmem:[#allocation2 + $0x210] sm:$0xff]  ;;  %v2151_v22 = vld [vmem:[#allocation2 + $0x228] sm:$0xff] }
 0x23a   : > { %v2171_v27 = vmax.f32 %v2130_v20, %v2151_v22  ;;  %v2018_v20 = vld [vmem:[#allocation2 + $0x240] sm:$0xff]  ;;  %v2041_v22 = vld [vmem:[#allocation2 + $0x250] sm:$0xff] }
 0x23b   : > { %v2227_v32 = vpack.c.bf16 %v2102_v25, %v2102_v25  ;;  %v2314_v25 = vpack.c.b16 %v2299_v18, %v2298_v17  ;;  %v2155_v17 = vld [vmem:[#allocation2 + $0x2e8] sm:$0xff] }
 0x23d   : > { %v2445_v34 = vunpack.c.l.b16 %v2227_v32 }
 0x23e   : > { %v1669_v26 = vpop.f32.mrf.mxu0 }
 0x23f   : > { %v1670_v28 = vadd.f32 %v4591_v13, %v1669_v26  ;;  %v2170_v26 = vmax.f32 %v2129_v19, %v2150_v21  ;;  %v2019_v21 = vld [vmem:[#allocation2 + $0x248] sm:$0xff] }
 0x240   : > { %v2081_v30 = vld [vmem:[#allocation2 + $0x148] sm:$0xff] }
 0x241   : > { %1922 = vst.msk [vmem:[#allocation2 + $0x150] sm:$0xff] %vm1879_vm2, %v1670_v28  ;;  %v2103_v31 = vmax.f32 %v2058_v29, %v2081_v30  ;;  %v2191_v28 = vld [vmem:[#allocation2 + $0x230] sm:$0xff]  ;;  %v2192_v29 = vld [vmem:[#allocation2 + $0x238] sm:$0xff] }
 0x242   : > { %v2211_v32 = vmax.f32 %v2170_v26, %v2191_v28  ;;  %v2175_v26 = vmax.f32 %v2134_v16, %v2155_v17  ;;  %v2196_v28 = vld [vmem:[#allocation2 + $0x2f8] sm:$0xff]  ;;  %v4652_v16 = vpop.f32.mrf.mxu1 }
 0x243   : > { %v2228_v33 = vpack.c.bf16 %v2103_v31, %v2103_v31 }
 0x245   : > { %v2446_v35 = vunpack.c.l.b16 %v2228_v33  ;;  %v2212_v33 = vmax.f32 %v2171_v27, %v2192_v29  ;;  %v2195_v27 = vld [vmem:[#allocation2 + $0x2f0] sm:$0xff] }
 0x246   : > { %v1671_v36 = vpop.f32.mrf.mxu0 }
 0x247   : > { %v1672_v37 = vadd.f32 %v4591_v13, %v1671_v36  ;;  %v2462_v39 = vpack.c.b16 %v2446_v35, %v2445_v34  ;;  %v2082_v35 = vld [vmem:[#allocation2 + $0x1a0] sm:$0xff]  ;;  %v2255_v36 = vpack.c.bf16 %v2211_v32, %v2211_v32 }
 0x248   : > { %v2125_v49 = vld [vmem:[#allocation2 + $0x150] sm:$0xff]  ;;  %v2086_v32 = vld [vmem:[#allocation2 + $0x260] sm:$0xff] }
 0x249   : > { %1923 = vst.msk [vmem:[#allocation2 + $0x158] sm:$0xff] %vm1879_vm2, %v1672_v37  ;;  %3585 = vmatmul.msk.bf16.gmra.mxu2 %vm1879_vm2, %v2462_v39  ;;  %3606 = vmatmul.msk.bf16.gmra.mxu3 %vm1879_vm2, %v2462_v39  ;;  %v2256_v37 = vpack.c.bf16 %v2212_v33, %v2212_v33  ;;  %v2087_v33 = vld [vmem:[#allocation2 + $0x268] sm:$0xff] }
 0x24e   : > { %v1674_v40 = vpop.f32.mrf.mxu0 }
 0x24f   : > { %v1675_v41 = vadd.f32 %v4591_v13, %v1674_v40 }
 0x250   : > { %v2126_v55 = vld [vmem:[#allocation2 + $0x158] sm:$0xff] }
 0x251   : > { %1924 = vst.msk [vmem:[#allocation2 + $0x160] sm:$0xff] %vm1879_vm2, %v1675_v41 }
 0x256   : > { %v1676_v42 = vpop.f32.mrf.mxu0 }
 0x257   : > { %v1677_v43 = vadd.f32 %v4591_v13, %v1676_v42  ;;  %v2083_v42 = vld [vmem:[#allocation2 + $0x1a8] sm:$0xff] }
 0x258   : > { %v2146_v48 = vld [vmem:[#allocation2 + $0x160] sm:$0xff] }
 0x259   : > { %1925 = vst.msk [vmem:[#allocation2 + $0x168] sm:$0xff] %vm1879_vm2, %v1677_v43  ;;  %v2166_v51 = vmax.f32 %v2125_v49, %v2146_v48  ;;  %v2300_v43 = vunpack.c.l.b16 %v2255_v36  ;;  %v2152_v48 = vld [vmem:[#allocation2 + $0x280] sm:$0xff]  ;;  %v2132_v49 = vld [vmem:[#allocation2 + $0x278] sm:$0xff] }
 0x25e   : > { %v1679_v44 = vpop.f32.mrf.mxu0 }
 0x25f   : > { %v1680_v45 = vadd.f32 %v4591_v13, %v1679_v44  ;;  %v2301_v44 = vunpack.c.l.b16 %v2256_v37 }
 0x260   : > { %v2147_v52 = vld [vmem:[#allocation2 + $0x168] sm:$0xff] }
 0x261   : > { %1926 = vst.msk [vmem:[#allocation2 + $0x170] sm:$0xff] %vm1879_vm2, %v1680_v45  ;;  %v2167_v57 = vmax.f32 %v2126_v55, %v2147_v52  ;;  %v2016_v52 = vld [vmem:[#allocation2 + $0x1e0] sm:$0xff]  ;;  %v2039_v55 = vld [vmem:[#allocation2 + $0x1f0] sm:$0xff] }
 0x262   : > { %v2061_v0 = vmax.f32 %v2016_v52, %v2039_v55  ;;  %v2156_v55 = vld [vmem:[#allocation2 + $0x340] sm:$0xff] }
 0x266   : > { %v1681_v46 = vpop.f32.mrf.mxu0 }
 0x267   : > { %v1682_v47 = vadd.f32 %v4591_v13, %v1681_v46 }
 0x268   : > { %v2187_v50 = vld [vmem:[#allocation2 + $0x170] sm:$0xff] }
 0x269   : > { %1927 = vst.msk [vmem:[#allocation2 + $0x178] sm:$0xff] %vm1879_vm2, %v1682_v47  ;;  %v2207_v53 = vmax.f32 %v2166_v51, %v2187_v50  ;;  %v2131_v47 = vld [vmem:[#allocation2 + $0x270] sm:$0xff]  ;;  %v2153_v50 = vld [vmem:[#allocation2 + $0x288] sm:$0xff] }
 0x26b   : > { %v2251_v60 = vpack.c.bf16 %v2207_v53, %v2207_v53  ;;  %v2172_v53 = vmax.f32 %v2131_v47, %v2152_v48  ;;  %v3870_v47 = vld [vmem:[%s4948_s5 + $0x74] sm:$0xf]  ;;  %v3642_v48 = vld [vmem:[%s4948_s5 + $0x78] sm:$0xf0] }
 0x26d   : > { %v2296_v2 = vunpack.c.l.b16 %v2251_v60  ;;  %v2173_v60 = vmax.f32 %v2132_v49, %v2153_v50 }
 0x26e   : > { %v1684_v54 = vpop.f32.mrf.mxu0 }
 0x26f   : > { %v1685_v56 = vadd.f32 %v4591_v13, %v1684_v54  ;;  %v2017_v54 = vld [vmem:[#allocation2 + $0x1e8] sm:$0xff] }
 0x270   : > { %v2188_v58 = vld [vmem:[#allocation2 + $0x178] sm:$0xff] }
 0x271   : > { %1928 = vst.msk [vmem:[#allocation2 + $0x180] sm:$0xff] %vm1879_vm2, %v1685_v56  ;;  %v2208_v59 = vmax.f32 %v2167_v57, %v2188_v58  ;;  %v2040_v56 = vld [vmem:[#allocation2 + $0x1f8] sm:$0xff]  ;;  %v2315_v57 = vpack.c.b16 %v2301_v44, %v2300_v43  ;;  %v3640_v44 = vld [vmem:[%s4948_s5 + $0x70] sm:$0xf] }
 0x272   : > { %v2062_v1 = vmax.f32 %v2017_v54, %v2040_v56  ;;  %v3863_v43 = vld [vmem:[%s4948_s5 + $0x34] sm:$0xf0]  ;;  %v2157_v56 = vld [vmem:[#allocation2 + $0x348] sm:$0xff] }
 0x273   : > { %v2252_v61 = vpack.c.bf16 %v2208_v59, %v2208_v59  ;;  %v2136_v54 = vld [vmem:[#allocation2 + $0x338] sm:$0xff] }
 0x275   : > { %v2297_v3 = vunpack.c.l.b16 %v2252_v61  ;;  %v2193_v61 = vld [vmem:[#allocation2 + $0x290] sm:$0xff] }
 0x276   : > { %v1686_v4 = vpop.f32.mrf.mxu0 }
 0x277   : > { %v1687_v5 = vadd.f32 %v4591_v13, %v1686_v4  ;;  %v2313_v6 = vpack.c.b16 %v2297_v3, %v2296_v2  ;;  %v2084_v2 = vld [vmem:[#allocation2 + $0x200] sm:$0xff]  ;;  %v2085_v3 = vld [vmem:[#allocation2 + $0x208] sm:$0xff]  ;;  %v2213_v4 = vmax.f32 %v2172_v53, %v2193_v61  ;;  %v3645_v53 = vor.u32 %v3870_v47, %v3642_v48  ;;  %v2043_v61 = vld [vmem:[#allocation2 + $0x2b0] sm:$0xff] }
 0x278   : > { %v2014_v31 = vld [vmem:[#allocation2 + $0x180] sm:$0xff]  ;;  %v2107_v7 = vmax.f32 %v2062_v1, %v2085_v3  ;;  %v2177_v1 = vmax.f32 %v2136_v54, %v2157_v56  ;;  %v2198_v3 = vld [vmem:[#allocation2 + $0x358] sm:$0xff] }
 0x279   : > { %1929 = vst.msk [vmem:[#allocation2 + $0x188] sm:$0xff] %vm1879_vm2, %v1687_v5  ;;  %3567 = vmatmul.msk.bf16.gmra.mxu1 %vm1879_vm2, %v2313_v6  ;;  %v2214_v5 = vmax.f32 %v2173_v60, %v2194_v62  ;;  %v2106_v6 = vmax.f32 %v2061_v0, %v2084_v2  ;;  %v2257_v8 = vpack.c.bf16 %v2213_v4, %v2213_v4  ;;  %v2021_v60 = vld [vmem:[#allocation2 + $0x2a8] sm:$0xff]  ;;  %v2044_v62 = vld [vmem:[#allocation2 + $0x2b8] sm:$0xff]  ;;  %v2197_v2 = vld [vmem:[#allocation2 + $0x350] sm:$0xff] }
 0x27a   : > { %v2232_v11 = vpack.c.bf16 %v2107_v7, %v2107_v7  ;;  %2780 = vmatpush.bf16.msra.mxu2 %v3645_v53  ;;  %v2088_v7 = vld [vmem:[#allocation2 + $0x2c0] sm:$0xff] }
 0x27b   : > { %v2258_v9 = vpack.c.bf16 %v2214_v5, %v2214_v5  ;;  %v2231_v10 = vpack.c.bf16 %v2106_v6, %v2106_v6  ;;  %v2302_v12 = vunpack.c.l.b16 %v2257_v8  ;;  %v2066_v6 = vmax.f32 %v2021_v60, %v2044_v62  ;;  %v2089_v8 = vld [vmem:[#allocation2 + $0x2c8] sm:$0xff]  ;;  %v2024_v56 = vld [vmem:[#allocation2 + $0x360] sm:$0xff]  ;;  %v2047_v60 = vld [vmem:[#allocation2 + $0x370] sm:$0xff] }
 0x27c   : > { %v2450_v19 = vunpack.c.l.b16 %v2232_v11 }
 0x27d   : > { %v2449_v18 = vunpack.c.l.b16 %v2231_v10  ;;  %v2218_v10 = vmax.f32 %v2177_v1, %v2198_v3  ;;  %v2069_v3 = vmax.f32 %v2024_v56, %v2047_v60 }
 0x27e   : > { %v1689_v14 = vpop.f32.mrf.mxu0 }
 0x27f   : > { %v1690_v15 = vadd.f32 %v4591_v13, %v1689_v14  ;;  %v2303_v14 = vunpack.c.l.b16 %v2258_v9  ;;  %v2464_v29 = vpack.c.b16 %v2450_v19, %v2449_v18 }
 0x280   : > { %v2015_v40 = vld [vmem:[#allocation2 + $0x188] sm:$0xff] }
 0x281   : > { %1930 = vst.msk [vmem:[#allocation2 + $0x190] sm:$0xff] %vm1879_vm2, %v1690_v15  ;;  %v2133_v15 = vld [vmem:[#allocation2 + $0x2d0] sm:$0xff] }
 0x286   : > { %v1691_v23 = vpop.f32.mrf.mxu0 }
 0x287   : > { %v1692_v24 = vadd.f32 %v4591_v13, %v1691_v23  ;;  %v2042_v23 = vld [vmem:[#allocation2 + $0x258] sm:$0xff] }
 0x288   : > { %v2037_v30 = vld [vmem:[#allocation2 + $0x190] sm:$0xff] }
 0x289   : > { %1931 = vst.msk [vmem:[#allocation2 + $0x198] sm:$0xff] %vm1879_vm2, %v1692_v24  ;;  %3568 = vmatmul.msk.bf16.gmra.mxu1 %vm1879_vm2, %v2314_v25  ;;  %v2059_v34 = vmax.f32 %v2014_v31, %v2037_v30  ;;  %v2316_v24 = vpack.c.b16 %v2303_v14, %v2302_v12  ;;  %v2174_v25 = vmax.f32 %v2133_v15, %v2154_v38 }
 0x28a   : > { %v2063_v30 = vmax.f32 %v2018_v20, %v2041_v22  ;;  %v2064_v31 = vmax.f32 %v2019_v21, %v2042_v23  ;;  %v2111_v12 = vmax.f32 %v2066_v6, %v2089_v8  ;;  %v2262_v15 = vpack.c.bf16 %v2218_v10, %v2218_v10  ;;  %v2137_v20 = vld [vmem:[#allocation2 + $0x390] sm:$0xff]  ;;  %v2138_v21 = vld [vmem:[#allocation2 + $0x398] sm:$0xff]  ;;  %v2158_v22 = vld [vmem:[#allocation2 + $0x3a0] sm:$0xff] }
 0x28b   : > { %v2104_v39 = vmax.f32 %v2059_v34, %v2082_v35  ;;  %v2215_v34 = vmax.f32 %v2174_v25, %v2195_v27  ;;  %v2216_v35 = vmax.f32 %v2175_v26, %v2196_v28  ;;  %v2159_v23 = vld [vmem:[#allocation2 + $0x3a8] sm:$0xff]  ;;  %v2022_v26 = vld [vmem:[#allocation2 + $0x300] sm:$0xff]  ;;  %v2045_v28 = vld [vmem:[#allocation2 + $0x310] sm:$0xff] }
 0x28c   : > { %v2108_v36 = vmax.f32 %v2063_v30, %v2086_v32  ;;  %v2109_v37 = vmax.f32 %v2064_v31, %v2087_v33  ;;  %v2236_v17 = vpack.c.bf16 %v2111_v12, %v2111_v12  ;;  %v2307_v19 = vunpack.c.l.b16 %v2262_v15  ;;  %v2023_v27 = vld [vmem:[#allocation2 + $0x308] sm:$0xff]  ;;  %v2199_v33 = vld [vmem:[#allocation2 + $0x3b0] sm:$0xff] }
 0x28d   : > { %v2229_v46 = vpack.c.bf16 %v2104_v39, %v2104_v39  ;;  %v2259_v39 = vpack.c.bf16 %v2215_v34, %v2215_v34  ;;  %v2178_v31 = vmax.f32 %v2137_v20, %v2158_v22  ;;  %v2179_v32 = vmax.f32 %v2138_v21, %v2159_v23  ;;  %v2200_v34 = vld [vmem:[#allocation2 + $0x3b8] sm:$0xff]  ;;  %v2093_v6 = vld [vmem:[#allocation2 + $0x388] sm:$0xff] }
 0x28e   : > { %v2454_v25 = vunpack.c.l.b16 %v2236_v17  ;;  %v3869_v8 = vld [vmem:[%s4948_s5 + $0x64] sm:$0xf0]  ;;  %v3634_v12 = vld [vmem:[%s4948_s5 + $0x68] sm:$0xf0]  ;;  %v3859_v20 = vld [vmem:[%s4948_s5 + $0x14] sm:$0xf0] }
 0x28f   : > { %v2447_v58 = vunpack.c.l.b16 %v2229_v46  ;;  %v3871_v46 = vld [vmem:[%s4948_s5 + $0x74] sm:$0xf0]  ;;  %v2304_v49 = vunpack.c.l.b16 %v2259_v39  ;;  %v4655_v39 = vpop.f32.mrf.mxu1 }
 0x290   : > { %v2038_v13 = vld [vmem:[#allocation2 + $0x198] sm:$0xff]  ;;  %v3641_v52 = vor.u32 %v3871_v46, %v3640_v44  ;;  %v4661_v44 = vpop.f32.mrf.mxu3 }
 0x291   : > { %v2060_v41 = vmax.f32 %v2015_v40, %v2038_v13  ;;  %v2260_v40 = vpack.c.bf16 %v2216_v35, %v2216_v35  ;;  %v2233_v13 = vpack.c.bf16 %v2108_v36, %v2108_v36  ;;  %v2067_v36 = vmax.f32 %v2022_v26, %v2045_v28  ;;  %v3650_v28 = vld [vmem:[%s4948_s5] sm:$0xf] }
 0x292   : > { %2766 = vmatpush.bf16.msra.mxu1 %v3641_v52 }
 0x293   : > { %v2105_v45 = vmax.f32 %v2060_v41, %v2083_v42  ;;  %v2234_v41 = vpack.c.bf16 %v2109_v37, %v2109_v37  ;;  %v3674_v42 = vld [vmem:[%s4948_s5 + $0x30] sm:$0xf]  ;;  %v2305_v50 = vunpack.c.l.b16 %v2260_v40  ;;  %v2090_v40 = vld [vmem:[#allocation2 + $0x320] sm:$0xff] }
 0x295   : > { %v2230_v51 = vpack.c.bf16 %v2105_v45, %v2105_v45  ;;  %v3675_v45 = vor.u32 %v3863_v43, %v3674_v42  ;;  %v2220_v42 = vmax.f32 %v2179_v32, %v2200_v34  ;;  %v4659_v43 = vpop.f32.mrf.mxu2  ;;  %v2050_v32 = vld [vmem:[#allocation2 + $0x3d8] sm:$0xff] }
 0x297   : > { %v2448_v59 = vunpack.c.l.b16 %v2230_v51  ;;  %v2135_v51 = vld [vmem:[#allocation2 + $0x330] sm:$0xff]  ;;  %2837 = vmatpush.bf16.msra.mxu3 %v3675_v45  ;;  %v2112_v45 = vmax.f32 %v2067_v36, %v2090_v40  ;;  %v2264_v48 = vpack.c.bf16 %v2220_v42, %v2220_v42 }
 0x298   : > { %v2176_v0 = vmax.f32 %v2135_v51, %v2156_v55  ;;  %v4663_v51 = vpop.f32.mrf.mxu1 }
 0x299   : > { %3569 = vmatmul.msk.bf16.gmra.mxu1 %vm1879_vm2, %v2315_v57  ;;  %v2463_v63 = vpack.c.b16 %v2448_v59, %v2447_v58  ;;  %v2451_v57 = vunpack.c.l.b16 %v2233_v13  ;;  %v2452_v58 = vunpack.c.l.b16 %v2234_v41  ;;  %v2020_v59 = vld [vmem:[#allocation2 + $0x2a0] sm:$0xff]  ;;  %v2091_v13 = vld [vmem:[#allocation2 + $0x328] sm:$0xff]  ;;  %v2219_v41 = vmax.f32 %v2178_v31, %v2199_v33  ;;  %v2049_v31 = vld [vmem:[#allocation2 + $0x3d0] sm:$0xff] }
 0x29a   : > { %v2065_v5 = vmax.f32 %v2020_v59, %v2043_v61  ;;  %v2217_v9 = vmax.f32 %v2176_v0, %v2197_v2  ;;  %v2309_v53 = vunpack.c.l.b16 %v2264_v48  ;;  %v2025_v59 = vld [vmem:[#allocation2 + $0x368] sm:$0xff]  ;;  %v2048_v61 = vld [vmem:[#allocation2 + $0x378] sm:$0xff] }
 0x29b   : > { %3586 = vmatmul.msk.bf16.gmra.mxu2 %vm1879_vm2, %v2463_v63  ;;  %3607 = vmatmul.msk.bf16.gmra.mxu3 %vm1879_vm2, %v2463_v63  ;;  %v2317_v63 = vpack.c.b16 %v2305_v50, %v2304_v49  ;;  %v2465_v4 = vpack.c.b16 %v2452_v58, %v2451_v57  ;;  %v2263_v47 = vpack.c.bf16 %v2219_v41, %v2219_v41  ;;  %v4667_v58 = vpop.f32.mrf.mxu3  ;;  %v3861_v0 = vld [vmem:[%s4948_s5 + $0x24] sm:$0xf0] }
 0x29c   : > { %v2110_v11 = vmax.f32 %v2065_v5, %v2088_v7  ;;  %v2261_v14 = vpack.c.bf16 %v2217_v9, %v2217_v9  ;;  %v2237_v49 = vpack.c.bf16 %v2112_v45, %v2112_v45  ;;  %v2092_v5 = vld [vmem:[#allocation2 + $0x380] sm:$0xff]  ;;  %v2095_v41 = vld [vmem:[#allocation2 + $0x3e8] sm:$0xff] }
 0x29d   : > { %v2308_v52 = vunpack.c.l.b16 %v2263_v47  ;;  %v4665_v57 = vpop.f32.mrf.mxu2  ;;  %v3632_v7 = vld [vmem:[%s4948_s5 + $0x60] sm:$0xf]  ;;  %v3868_v9 = vld [vmem:[%s4948_s5 + $0x64] sm:$0xf] }
 0x29e   : > { %v2235_v38 = vpack.c.bf16 %v2110_v11, %v2110_v11  ;;  %v2306_v18 = vunpack.c.l.b16 %v2261_v14  ;;  %v2455_v54 = vunpack.c.l.b16 %v2237_v49  ;;  %v3633_v11 = vor.u32 %v3869_v8, %v3632_v7 }
 0x29f   : > { %v2319_v62 = vpack.c.b16 %v2309_v53, %v2308_v52  ;;  %v2114_v14 = vmax.f32 %v2069_v3, %v2092_v5 }
 0x2a0   : > { %v2318_v30 = vpack.c.b16 %v2307_v19, %v2306_v18  ;;  %v2378_v10 = vpop.f32.mrf.mxu1  ;;  %2767 = vmatpush.bf16.msra.mxu1 %v3633_v11  ;;  %v3658_v19 = vld [vmem:[%s4948_s5 + $0x10] sm:$0xf] }
 0x2a1   : > { %v3659_v21 = vor.u32 %v3859_v20, %v3658_v19  ;;  %v2239_v22 = vpack.c.bf16 %v2114_v14, %v2114_v14 }
 0x2a3   : > { %v2609_v18 = vpop.f32.mrf.mxu3 }
 0x2a5   : > { %v2525_v17 = vpop.f32.mrf.mxu2 }
 0x2a9   : > { %3570 = vmatmul.msk.bf16.gmra.mxu1 %vm1879_vm2, %v2316_v24  ;;  %v2453_v24 = vunpack.c.l.b16 %v2235_v38  ;;  %v3637_v38 = vor.u32 %v3868_v9, %v3634_v12  ;;  %v3867_v9 = vld [vmem:[%s4948_s5 + $0x54] sm:$0xf0] }
 0x2ab   : > { %3587 = vmatmul.msk.bf16.gmra.mxu2 %vm1879_vm2, %v2464_v29  ;;  %3608 = vmatmul.msk.bf16.gmra.mxu3 %vm1879_vm2, %v2464_v29  ;;  %v2046_v29 = vld [vmem:[#allocation2 + $0x318] sm:$0xff]  ;;  %v2466_v35 = vpack.c.b16 %v2454_v25, %v2453_v24  ;;  %v2381_v24 = vpop.f32.mrf.mxu1  ;;  %v2457_v25 = vunpack.c.l.b16 %v2239_v22 }
 0x2ac   : > { %v2068_v37 = vmax.f32 %v2023_v27, %v2046_v29  ;;  %2781 = vmatpush.bf16.msra.mxu2 %v3637_v38  ;;  %v2026_v27 = vld [vmem:[#allocation2 + $0x3c0] sm:$0xff]  ;;  %v3857_v29 = vld [vmem:[%s4948_s5 + $0x4] sm:$0xf0] }
 0x2ad   : > { %v3651_v33 = vor.u32 %v3857_v29, %v3650_v28  ;;  %v2527_v34 = vpop.f32.mrf.mxu2 }
 0x2ae   : > { %v2113_v46 = vmax.f32 %v2068_v37, %v2091_v13  ;;  %v2071_v37 = vmax.f32 %v2026_v27, %v2049_v31  ;;  %v2094_v13 = vld [vmem:[#allocation2 + $0x3e0] sm:$0xff] }
 0x2b0   : > { %v2238_v50 = vpack.c.bf16 %v2113_v46, %v2113_v46  ;;  %v2116_v42 = vmax.f32 %v2071_v37, %v2094_v13 }
 0x2b2   : > { %v2456_v55 = vunpack.c.l.b16 %v2238_v50  ;;  %v2568_v49 = vpack.c.bf16 %v2116_v42, %v2116_v42  ;;  %v3676_v42 = vld [vmem:[%s4948_s5 + $0x38] sm:$0xf0] }
 0x2b3   : > { %v2383_v46 = vpop.f32.mrf.mxu1 }
 0x2b4   : > { %v2467_v2 = vpack.c.b16 %v2456_v55, %v2455_v54  ;;  %v2577_v52 = vunpack.c.l.b16 %v2568_v49  ;;  %v2528_v55 = vadd.f32 %v2527_v34, %v2378_v10  ;;  %v3864_v34 = vld [vmem:[%s4948_s5 + $0x44] sm:$0xf] }
 0x2b5   : > { %v2530_v47 = vpop.f32.mrf.mxu2 }
 0x2b6   : > { %v2531_v5 = vadd.f32 %v2530_v47, %v2381_v24  ;;  %v3860_v47 = vld [vmem:[%s4948_s5 + $0x24] sm:$0xf] }
 0x2b9   : > { %3571 = vmatmul.msk.bf16.gmra.mxu1 %vm1879_vm2, %v2317_v63  ;;  %v3666_v63 = vld [vmem:[%s4948_s5 + $0x20] sm:$0xf] }
 0x2ba   : > { %v3667_v1 = vor.u32 %v3861_v0, %v3666_v63 }
 0x2bb   : > { %3588 = vmatmul.msk.bf16.gmra.mxu2 %vm1879_vm2, %v2465_v4  ;;  %3609 = vmatmul.msk.bf16.gmra.mxu3 %vm1879_vm2, %v2465_v4  ;;  %v2070_v4 = vmax.f32 %v2025_v59, %v2048_v61  ;;  %v2523_v61 = vadd.f32 %v4665_v57, %v4655_v39 }
 0x2bc   : > { %2838 = vmatpush.bf16.msra.mxu3 %v3667_v1  ;;  %v2521_v1 = vadd.f32 %v4659_v43, %v4652_v16 }
 0x2bd   : > { %v2115_v15 = vmax.f32 %v2070_v4, %v2093_v6  ;;  %v2532_v59 = vpop.f32.mrf.mxu2  ;;  %v2653_v3 = vadd.f32 %v4667_v58, %v2523_v61  ;;  %v3624_v58 = vld [vmem:[%s4948_s5 + $0x50] sm:$0xf]  ;;  %v3652_v61 = vld [vmem:[%s4948_s5 + $0x8] sm:$0xf0] }
 0x2be   : > { %v2533_v0 = vadd.f32 %v2532_v59, %v2383_v46  ;;  %v3625_v14 = vor.u32 %v3867_v9, %v3624_v58 }
 0x2bf   : > { %v2240_v23 = vpack.c.bf16 %v2115_v15, %v2115_v15  ;;  %v3626_v15 = vld [vmem:[%s4948_s5 + $0x58] sm:$0xf0] }
 0x2c0   : > { %2839 = vmatpush.bf16.msra.mxu3 %v3659_v21  ;;  %2768 = vmatpush.bf16.msra.mxu1 %v3625_v14 }
 0x2c1   : > { %v2458_v26 = vunpack.c.l.b16 %v2240_v23 }
 0x2c3   : > { %v2468_v36 = vpack.c.b16 %v2458_v26, %v2457_v25 }
 0x2c4   : > { %2840 = vmatpush.bf16.msra.mxu3 %v3651_v33  ;;  %v3865_v33 = vld [vmem:[%s4948_s5 + $0x44] sm:$0xf0] }
 0x2c9   : > { %3572 = vmatmul.msk.bf16.gmra.mxu1 %vm1879_vm2, %v2318_v30  ;;  %v2027_v30 = vld [vmem:[#allocation2 + $0x3c8] sm:$0xff] }
 0x2ca   : > { %v2072_v40 = vmax.f32 %v2027_v30, %v2050_v32  ;;  %v3616_v32 = vld [vmem:[%s4948_s5 + $0x40] sm:$0xf] }
 0x2cb   : > { %3589 = vmatmul.msk.bf16.gmra.mxu2 %vm1879_vm2, %v2466_v35  ;;  %3610 = vmatmul.msk.bf16.gmra.mxu3 %vm1879_vm2, %v2466_v35  ;;  %v2611_v35 = vpop.f32.mrf.mxu3 }
 0x2cc   : > { %v2117_v45 = vmax.f32 %v2072_v40, %v2095_v41  ;;  %v2655_v63 = vadd.f32 %v2611_v35, %v2528_v55  ;;  %v2535_v22 = vpop.f32.mrf.mxu2  ;;  %v3617_v35 = vor.u32 %v3865_v33, %v3616_v32  ;;  %v3862_v41 = vld [vmem:[%s4948_s5 + $0x34] sm:$0xf]  ;;  %v3660_v55 = vld [vmem:[%s4948_s5 + $0x18] sm:$0xf0]  ;;  %v3876_v33 = vld [vmem:[%s4948_s5 + $0xa4] sm:$0xf] }
 0x2cd   : > { %v3679_v46 = vor.u32 %v3862_v41, %v3676_v42 }
 0x2ce   : > { %v2569_v50 = vpack.c.bf16 %v2117_v45, %v2117_v45  ;;  %2769 = vmatpush.bf16.msra.mxu1 %v3617_v35  ;;  %v3700_v35 = vld [vmem:[%s4948_s5 + $0xa0] sm:$0xf] }
 0x2d0   : > { %v2578_v53 = vunpack.c.l.b16 %v2569_v50 }
 0x2d2   : > { %v2579_v56 = vpack.c.b16 %v2578_v53, %v2577_v52  ;;  %2851 = vmatpush.bf16.msrb.mxu1 %v3679_v46  ;;  %v3858_v53 = vld [vmem:[%s4948_s5 + $0x14] sm:$0xf]  ;;  %v3694_v46 = vld [vmem:[%s4948_s5 + $0x98] sm:$0xf0] }
 0x2d3   : > { %v2614_v48 = vpop.f32.mrf.mxu3  ;;  %v3663_v59 = vor.u32 %v3858_v53, %v3660_v55  ;;  %v3872_v55 = vld [vmem:[%s4948_s5 + $0x84] sm:$0xf] }
 0x2d4   : > { %v2656_v7 = vadd.f32 %v2614_v48, %v2531_v5  ;;  %v2537_v24 = vpop.f32.mrf.mxu2  ;;  %v3668_v48 = vld [vmem:[%s4948_s5 + $0x28] sm:$0xf0] }
 0x2d5   : > { %v3671_v49 = vor.u32 %v3860_v47, %v3668_v48  ;;  %v3692_v47 = vld [vmem:[%s4948_s5 + $0x90] sm:$0xf] }
 0x2d7   : > { %2852 = vmatpush.bf16.msrb.mxu1 %v3671_v49 }
 0x2d9   : > { %3573 = vmatmul.msk.bf16.gmra.mxu1 %vm1879_vm2, %v2319_v62  ;;  %v2526_v62 = vadd.f32 %v2525_v17, %v4663_v51  ;;  %v2652_v51 = vadd.f32 %v4661_v44, %v2521_v1  ;;  %v3866_v44 = vld [vmem:[%s4948_s5 + $0x54] sm:$0xf] }
 0x2da   : > { %v3629_v38 = vor.u32 %v3866_v44, %v3626_v15 }
 0x2db   : > { %3590 = vmatmul.msk.bf16.gmra.mxu2 %vm1879_vm2, %v2467_v2  ;;  %3611 = vmatmul.msk.bf16.gmra.mxu3 %vm1879_vm2, %v2467_v2  ;;  %v2616_v60 = vpop.f32.mrf.mxu3  ;;  %v4715_v2 = vld [vmem:[%s4947_s4] ss:$0 sm:$0xff]  ;;  %v2654_v4 = vadd.f32 %v2609_v18, %v2526_v62 }
 0x2dc   : > { %v2657_v6 = vadd.f32 %v2616_v60, %v2533_v0  ;;  %v2677_v57 = vadd.f32 %v4715_v2, %v2655_v63  ;;  %v2675_v8 = vadd.f32 %v4715_v2, %v2653_v3  ;;  %v2674_v10 = vadd.f32 %v4715_v2, %v2652_v51  ;;  %2782 = vmatpush.bf16.msra.mxu2 %v3629_v38  ;;  %v3856_v60 = vld [vmem:[%s4948_s5 + $0x4] sm:$0xf] }
 0x2dd   : > { %v2676_v16 = vadd.f32 %v4715_v2, %v2654_v4  ;;  %v2678_v12 = vadd.f32 %v4715_v2, %v2656_v7  ;;  %2853 = vmatpush.bf16.msrb.mxu1 %v3663_v59  ;;  %v3655_v62 = vor.u32 %v3856_v60, %v3652_v61  ;;  %v3684_v59 = vld [vmem:[%s4948_s5 + $0x80] sm:$0xf]  ;;  %v3873_v61 = vld [vmem:[%s4948_s5 + $0x84] sm:$0xf0] }
 0x2de   : > { %v2679_v43 = vadd.f32 %v4715_v2, %v2657_v6  ;;  %v2693_v11 = vmax.f32 %v2675_v8, %v2677_v57 }
 0x2df   : > { %v2692_v17 = vmax.f32 %v2674_v10, %v2676_v16 }
 0x2e0   : > { %v2695_v18 = vmax.f32 %v2693_v11, %v2679_v43 }
 0x2e1   : > { %v2694_v20 = vmax.f32 %v2692_v17, %v2678_v12  ;;  %2854 = vmatpush.bf16.msrb.mxu1 %v3655_v62  ;;  %v3685_v62 = vor.u32 %v3873_v61, %v3684_v59 }
 0x2e3   : > { %v4739_v21 = vpack.c.bf16 %v2695_v18, %v2694_v20 }
 0x2eb   : > { %3591 = vmatmul.msk.bf16.gmra.mxu2 %vm1879_vm2, %v2468_v36  ;;  %3612 = vmatmul.msk.bf16.gmra.mxu3 %vm1879_vm2, %v2468_v36  ;;  %v3618_v36 = vld [vmem:[%s4948_s5 + $0x48] sm:$0xf0] }
 0x2ec   : > { %v3621_v37 = vor.u32 %v3864_v34, %v3618_v36  ;;  %v3702_v34 = vld [vmem:[%s4948_s5 + $0xa8] sm:$0xf0] }
 0x2ed   : > { %v3705_v36 = vor.u32 %v3876_v33, %v3702_v34  ;;  %v3891_v33 = vld [vmem:[%s4950_s7 + $0x58] sm:$0xff]  ;;  %v3882_v34 = vld [vmem:[%s4950_s7 + $0x10] sm:$0xff] }
 0x2ee   : > { %2783 = vmatpush.bf16.msra.mxu2 %v3621_v37  ;;  %v3877_v37 = vld [vmem:[%s4948_s5 + $0xa4] sm:$0xf0] }
 0x2f6   : > { %v4704_v54 = vpop.f32.mrf.mxu1 }
 0x2f7   : > { %v2536_v5 = vadd.f32 %v2535_v22, %v4704_v54 }
 0x2fb   : > { %3613 = vmatmul.msk.bf16.gmra.mxu3 %vm1879_vm2, %v2579_v56 }
 0x2fe   : > { %v4718_v39 = vpop.f32.mrf.mxu1 }
 0x2ff   : > { %v2538_v6 = vadd.f32 %v2537_v24, %v4718_v39 }
 0x306   : > { %v2391_v19 = vpop.f32.mrf.mxu1 }
 0x30b   : > { %3680 = vmatmul.msk.bf16.vlgmr.msra.gmra.mxu3 %vm2758_vm3, %v4739_v21 }
 0x30e   : > { %v2393_v23 = vpop.f32.mrf.mxu1 }
 0x316   : > { %v2396_v25 = vpop.f32.mrf.mxu1 }
 0x31e   : > { %v2398_v26 = vpop.f32.mrf.mxu1  ;;  %v2540_v27 = vpop.f32.mrf.mxu2 }
 0x31f   : > { %v2619_v28 = vpop.f32.mrf.mxu3  ;;  %v2541_v3 = vadd.f32 %v2540_v27, %v2391_v19  ;;  %v3708_v27 = vld [vmem:[%s4948_s5 + $0xb0] sm:$0xf] }
 0x320   : > { %v2658_v8 = vadd.f32 %v2619_v28, %v2536_v5 }
 0x322   : > { %v2680_v54 = vadd.f32 %v4715_v2, %v2658_v8 }
 0x326   : > { %v4743_v29 = vpop.f32.mrf.mxu1  ;;  %v2542_v30 = vpop.f32.mrf.mxu2 }
 0x327   : > { %v2621_v31 = vpop.f32.mrf.mxu3  ;;  %v2543_v4 = vadd.f32 %v2542_v30, %v2393_v23 }
 0x328   : > { %v2659_v16 = vadd.f32 %v2621_v31, %v2538_v6  ;;  %v3879_v31 = vld [vmem:[%s4948_s5 + $0xb4] sm:$0xf0] }
 0x329   : > { %v3709_v32 = vor.u32 %v3879_v31, %v3708_v27  ;;  %v3885_v27 = vld [vmem:[%s4950_s7 + $0x28] sm:$0xff]  ;;  %v3892_v31 = vld [vmem:[%s4950_s7 + $0x60] sm:$0xff] }
 0x32a   : > { %v2681_v39 = vadd.f32 %v4715_v2, %v2659_v16 }
 0x32b   : > { %2921 = vmatpush.bf16.msrb.mxu2 %v3709_v32  ;;  %v3883_v32 = vld [vmem:[%s4950_s7 + $0x18] sm:$0xff] }
 0x32e   : > { %v4757_v40 = vpop.f32.mrf.mxu1  ;;  %v2545_v13 = vpop.f32.mrf.mxu2 }
 0x32f   : > { %v2624_v45 = vpop.f32.mrf.mxu3  ;;  %v2546_v51 = vadd.f32 %v2545_v13, %v2396_v25  ;;  %v3878_v25 = vld [vmem:[%s4948_s5 + $0xb4] sm:$0xf]  ;;  %v3701_v13 = vor.u32 %v3877_v37, %v3700_v35  ;;  %v3881_v37 = vld [vmem:[%s4950_s7 + $0x8] sm:$0xff] }
 0x330   : > { %v2660_v57 = vadd.f32 %v2624_v45, %v2541_v3  ;;  %v3874_v45 = vld [vmem:[%s4948_s5 + $0x94] sm:$0xf] }
 0x331   : > { %2922 = vmatpush.bf16.msrb.mxu2 %v3701_v13  ;;  %v3697_v49 = vor.u32 %v3874_v45, %v3694_v46  ;;  %v3890_v35 = vld [vmem:[%s4950_s7 + $0x50] sm:$0xff]  ;;  %v3889_v13 = vld [vmem:[%s4950_s7 + $0x48] sm:$0xff] }
 0x332   : > { %v2682_v58 = vadd.f32 %v4715_v2, %v2660_v57 }
 0x334   : > { %v2705_v38 = vmax.f32 %v2680_v54, %v2682_v58 }
 0x336   : > { %v4771_v50 = vpop.f32.mrf.mxu1  ;;  %v2547_v52 = vpop.f32.mrf.mxu2 }
 0x337   : > { %v2626_v56 = vpop.f32.mrf.mxu3  ;;  %v2548_v9 = vadd.f32 %v2547_v52, %v2398_v26  ;;  %v3710_v26 = vld [vmem:[%s4948_s5 + $0xb8] sm:$0xf0]  ;;  %v3875_v52 = vld [vmem:[%s4948_s5 + $0x94] sm:$0xf0] }
 0x338   : > { %v2661_v7 = vadd.f32 %v2626_v56, %v2543_v4  ;;  %v3713_v30 = vor.u32 %v3878_v25, %v3710_v26  ;;  %v3693_v53 = vor.u32 %v3875_v52, %v3692_v47  ;;  %v3686_v56 = vld [vmem:[%s4948_s5 + $0x88] sm:$0xf0]  ;;  %v3895_v25 = vld [vmem:[%s4950_s7 + $0x78] sm:$0xff]  ;;  %v3894_v26 = vld [vmem:[%s4950_s7 + $0x70] sm:$0xff] }
 0x339   : > { %v3689_v60 = vor.u32 %v3872_v55, %v3686_v56  ;;  %v2949_v56 = vld [vmem:[%s4949_s6] sm:$0x3] }
 0x33a   : > { %v2683_v44 = vadd.f32 %v4715_v2, %v2661_v7  ;;  %2935 = vmatpush.bf16.msrb.mxu3 %v3713_v30  ;;  %2923 = vmatpush.bf16.msrb.mxu2 %v3693_v53  ;;  %v3884_v30 = vld [vmem:[%s4950_s7 + $0x20] sm:$0xff] }
 0x33c   : > { %v2706_v17 = vmax.f32 %v2681_v39, %v2683_v44 }
 0x33e   : > { %v4785_v63 = vpop.f32.mrf.mxu1  ;;  %v4787_v0 = vpop.f32.mrf.mxu2  ;;  %2936 = vmatpush.bf16.msrb.mxu3 %v3705_v36  ;;  %2924 = vmatpush.bf16.msrb.mxu2 %v3685_v62 }
 0x33f   : > { %v2629_v1 = vpop.f32.mrf.mxu3  ;;  %v2551_v16 = vadd.f32 %v4787_v0, %v4743_v29 }
 0x340   : > { %v2662_v43 = vadd.f32 %v2629_v1, %v2546_v51 }
 0x342   : > { %v2684_v14 = vadd.f32 %v4715_v2, %v2662_v43  ;;  %2937 = vmatpush.bf16.msrb.mxu3 %v3697_v49 }
 0x344   : > { %v2707_v19 = vmax.f32 %v2705_v38, %v2684_v14 }
 0x346   : > { %v4793_v10 = vpop.f32.mrf.mxu1  ;;  %v4795_v11 = vpop.f32.mrf.mxu2  ;;  %2938 = vmatpush.bf16.msrb.mxu3 %v3689_v60 }
 0x347   : > { %v2631_v12 = vpop.f32.mrf.mxu3  ;;  %v2553_v43 = vadd.f32 %v4795_v11, %v4757_v40 }
 0x348   : > { %v2663_v15 = vadd.f32 %v2631_v12, %v2548_v9 }
 0x34a   : > { %v2685_v18 = vadd.f32 %v4715_v2, %v2663_v15 }
 0x34c   : > { %v2708_v20 = vmax.f32 %v2706_v17, %v2685_v18 }
 0x34e   : > { %v2709_v22 = vpack.c.bf16 %v2708_v20, %v2707_v19  ;;  %v2413_v23 = vpop.f32.mrf.mxu1  ;;  %v2555_v24 = vpop.f32.mrf.mxu2 }
 0x34f   : > { %v2634_v28 = vpop.f32.mrf.mxu3  ;;  %v2556_v7 = vadd.f32 %v2555_v24, %v4771_v50  ;;  %v3887_v24 = vld [vmem:[%s4950_s7 + $0x38] sm:$0xff] }
 0x350   : > { %3646 = vmatmul.msk.bf16.vlgmr.msra.gmra.mxu1 %vm2758_vm3, %v2709_v22  ;;  %3647 = vmatmul.msk.bf16.vlgmr.msra.gmra.mxu2 %vm2758_vm3, %v2709_v22  ;;  %v2664_v12 = vadd.f32 %v2634_v28, %v2551_v16  ;;  %v3893_v28 = vld [vmem:[%s4950_s7 + $0x68] sm:$0xff] }
 0x351   : > { %3097 = vmatpush.bf16.msra.mxu1 %v3887_v24  ;;  %3111 = vmatpush.bf16.msra.mxu2 %v3895_v25 }
 0x352   : > { %v2686_v38 = vadd.f32 %v4715_v2, %v2664_v12 }
 0x355   : > { %3112 = vmatpush.bf16.msra.mxu2 %v3894_v26 }
 0x356   : > { %v2416_v41 = vpop.f32.mrf.mxu1  ;;  %v2557_v42 = vpop.f32.mrf.mxu2 }
 0x357   : > { %v2636_v48 = vpop.f32.mrf.mxu3  ;;  %v2558_v8 = vadd.f32 %v2557_v42, %v4785_v63  ;;  %v3880_v41 = vld [vmem:[%s4950_s7] sm:$0xff] }
 0x358   : > { %v3888_v42 = vld [vmem:[%s4950_s7 + $0x40] sm:$0xff] }
 0x359   : > { %3113 = vmatpush.bf16.msra.mxu2 %v3893_v28 }
 0x35d   : > { %3114 = vmatpush.bf16.msra.mxu2 %v3892_v31 }
 0x35e   : > { %v2417_v1 = vpop.f32.mrf.mxu1  ;;  %v2560_v3 = vpop.f32.mrf.mxu2 }
 0x35f   : > { %v2639_v4 = vpop.f32.mrf.mxu3  ;;  %v2561_v58 = vadd.f32 %v2560_v3, %v4793_v10  ;;  %v2951_v1 = vperm.slane %v2949_v56, 0 }
 0x360   : > { %3681 = vmatmul.msk.bf16.vlgmr.msrb.gmra.mxu1 %vm2758_vm3, %v4739_v21  ;;  %v2666_v9 = vadd.f32 %v2639_v4, %v2556_v7  ;;  %v2665_v21 = vadd.f32 %v2636_v48, %v2553_v43  ;;  %v2952_v4 = vperm.slane %v2949_v56, 1 }
 0x361   : > { %3115 = vmatpush.bf16.msra.mxu2 %v3891_v33 }
 0x362   : > { %v2688_v39 = vadd.f32 %v4715_v2, %v2666_v9  ;;  %v2687_v29 = vadd.f32 %v4715_v2, %v2665_v21 }
 0x364   : > { %v2861_v10 = vmax.f32 %v2686_v38, %v2688_v39 }
 0x365   : > { %3116 = vmatpush.bf16.msra.mxu2 %v3890_v35 }
 0x366   : > { %v2562_v5 = vpop.f32.mrf.mxu2 }
 0x367   : > { %v2641_v6 = vpop.f32.mrf.mxu3  ;;  %v2563_v14 = vadd.f32 %v2562_v5, %v2413_v23 }
 0x368   : > { %v2667_v44 = vadd.f32 %v2641_v6, %v2558_v8 }
 0x369   : > { %3117 = vmatpush.bf16.msra.mxu2 %v3889_v13 }
 0x36a   : > { %v2689_v50 = vadd.f32 %v4715_v2, %v2667_v44 }
 0x36c   : > { %v2862_v11 = vmax.f32 %v2687_v29, %v2689_v50 }
 0x36d   : > { %3118 = vmatpush.bf16.msra.mxu2 %v3888_v42 }
 0x36e   : > { %v2565_v51 = vpop.f32.mrf.mxu2 }
 0x36f   : > { %v2644_v57 = vpop.f32.mrf.mxu3 }
 0x370   : > { %v2668_v54 = vadd.f32 %v2644_v57, %v2561_v58 }
 0x372   : > { %v2690_v40 = vadd.f32 %v4715_v2, %v2668_v54 }
 0x374   : > { %v2863_v18 = vmax.f32 %v2861_v10, %v2690_v40 }
 0x376   : > { %v2566_v15 = vpop.f32.mrf.mxu2 }
 0x377   : > { %v2646_v63 = vpop.f32.mrf.mxu3  ;;  %v3939_v15 = vld [vmem:[%s4951_s8] ss:$0 sm:$0xff] }
 0x378   : > { %v2669_v0 = vadd.f32 %v2646_v63, %v2563_v14 }
 0x37a   : > { %v2691_v17 = vadd.f32 %v4715_v2, %v2669_v0  ;;  %v3886_v2 = vld [vmem:[%s4950_s7 + $0x30] sm:$0xff] }
 0x37b   : > { %3098 = vmatpush.bf16.msra.mxu1 %v3886_v2 }
 0x37c   : > { %v2864_v19 = vmax.f32 %v2862_v11, %v2691_v17 }
 0x37e   : > { %v2865_v20 = vpack.c.bf16 %v2864_v19, %v2863_v18 }
 0x37f   : > { %v2649_v22 = vpop.f32.mrf.mxu3  ;;  %3099 = vmatpush.bf16.msra.mxu1 %v3885_v27 }
 0x380   : > { %3714 = vmatmul.msk.bf16.vlgmr.msrb.gmra.mxu2 %vm2758_vm3, %v2865_v20  ;;  %3715 = vmatmul.msk.bf16.vlgmr.msrb.gmra.mxu3 %vm2758_vm3, %v2865_v20 }
 0x383   : > { %3100 = vmatpush.bf16.msra.mxu1 %v3884_v30 }
 0x387   : > { %v2650_v23 = vpop.f32.mrf.mxu3  ;;  %3101 = vmatpush.bf16.msra.mxu1 %v3883_v32 }
 0x38b   : > { %3102 = vmatpush.bf16.msra.mxu1 %v3882_v34 }
 0x38f   : > { %3103 = vmatpush.bf16.msra.mxu1 %v3881_v37  ;;  %v2842_v45 = vpop.f32.mrf.mxu3 }
 0x393   : > { %3104 = vmatpush.bf16.msra.mxu1 %v3880_v41 }
 0x397   : > { %v2844_v48 = vpop.f32.mrf.mxu3 }
 0x3cd   : > { %v2771_v36 = vpop.f32.mrf.mxu1 }
 0x3ce   : > { %v2843_v59 = vadd.f32 %v2842_v45, %v2771_v36 }
 0x3d3   : > { %v2785_v46 = vpop.f32.mrf.mxu2 }
 0x3d5   : > { %v2773_v47 = vpop.f32.mrf.mxu1 }
 0x3d6   : > { %v2845_v5 = vadd.f32 %v2844_v48, %v2773_v47 }
 0x3db   : > { %v2787_v49 = vpop.f32.mrf.mxu2 }
 0x3dd   : > { %v2856_v52 = vpop.f32.mrf.mxu1 }
 0x3de   : > { %v2857_v60 = vadd.f32 %v2856_v52, %v2785_v46 }
 0x3e5   : > { %v2858_v61 = vpop.f32.mrf.mxu1 }
 0x3e6   : > { %v2859_v6 = vadd.f32 %v2858_v61, %v2787_v49 }
 0x403   : > { %v2926_v53 = vpop.f32.mrf.mxu2  ;;  %v2940_v55 = vpop.f32.mrf.mxu3 }
 0x404   : > { %v2945_v62 = vadd.f32 %v2926_v53, %v2843_v59  ;;  %v2946_v3 = vadd.f32 %v2940_v55, %v2857_v60 }
 0x406   : > { %v2955_v7 = vadd.f32 %v2951_v1, %v2945_v62  ;;  %v2956_v8 = vadd.f32 %v2952_v4, %v2946_v3 }
 0x408   : > { %v2959_v44 = vmax.f32 %v2955_v7, 0.0  ;;  %v2960_v12 = vmax.f32 %v2956_v8, 0.0 }
 0x40b   : > { %v2928_v51 = vpop.f32.mrf.mxu2  ;;  %v2942_v57 = vpop.f32.mrf.mxu3 }
 0x40c   : > { %v2947_v16 = vadd.f32 %v2928_v51, %v2845_v5  ;;  %v2948_v43 = vadd.f32 %v2942_v57, %v2859_v6 }
 0x40e   : > { %v2957_v58 = vadd.f32 %v2951_v1, %v2947_v16  ;;  %v2958_v9 = vadd.f32 %v2952_v4, %v2948_v43 }
 0x410   : > { %v2961_v21 = vmax.f32 %v2957_v58, 0.0  ;;  %v2962_v54 = vmax.f32 %v2958_v9, 0.0 }
 0x412   : > { %v2963_v39 = vpack.c.bf16 %v2961_v21, %v2959_v44  ;;  %v2964_v14 = vpack.c.bf16 %v2962_v54, %v2960_v12 }
 0x414   : > { %3105 = vmatmul.bf16.vlgmr.msra.gmra.mxu1 %v2963_v39  ;;  %3119 = vmatmul.bf16.vlgmr.msra.gmra.mxu2 %v2964_v14 }
 0x491   : > { %v3106_v50 = vpop.f32.mrf.mxu1 }
 0x492   : > { %v3107_v63 = vadd.f32 %v3939_v15, %v3106_v50 }
 0x497   : > { %v3120_v38 = vpop.f32.mrf.mxu2 }
 0x498   : > { %v3121_v29 = vadd.f32 %v3120_v38, %v3107_v63 }
 0x499   : > { %v3108_v0 = vpop.f32.mrf.mxu1 }
 0x49a   : > { %v3126_v40 = vsel %vm3125_vm4, %v3121_v29, -inf  ;;  %v3109_v10 = vadd.f32 %v3939_v15, %v3108_v0 }
 0x49b   : > { %3127 = vmax.xlane.f32.xlu0 %v3126_v40 }
 0x49f   : > { %v3122_v11 = vpop.f32.mrf.mxu2 }
 0x4a0   : > { %v3123_v17 = vadd.f32 %v3122_v11, %v3109_v10 }
 0x4a2   : > { %v3129_v18 = vsel %vm3125_vm4, %v3123_v17, -inf }
 0x4a3   : > { %3130 = vmax.xlane.f32.xlu0 %v3129_v18 }
 0x50e   : > { %v3128_v19 = vpop.xlane.xlu0 %3127 }
 0x50f   : > { %v3132_v20 = vsub.f32 %v3121_v29, %v3128_v19 }
 0x511   : > { %v3134_v22 = vmul.f32 1.442695, %v3132_v20 }
 0x513   : > { %3940 = vpow2.f32 %v3134_v22 }
 0x516   : > { %v3131_v23 = vpop.xlane.xlu0 %3130 }
 0x517   : > { %v3133_v24 = vsub.f32 %v3123_v17, %v3131_v23 }
 0x519   : > { %v3941_v25 = vpop.eup %3940  ;;  %v3136_v2 = vmul.f32 1.442695, %v3133_v24 }
 0x51a   : > { %v3138_v26 = vsel %vm3125_vm4, %v3941_v25, 0.0 }
 0x51b   : > { %3942 = vpow2.f32 %v3136_v2  ;;  %3139 = vadd.xlane.f32.xlu1 %v3138_v26 }
 0x521   : > { %v3943_v27 = vpop.eup %3942 }
 0x522   : > { %v3141_v28 = vsel %vm3125_vm4, %v3943_v27, 0.0 }
 0x523   : > { %3142 = vadd.xlane.f32.xlu1 %v3141_v28 }
 0x58e   : > { %v3140_v30 = vpop.xlane.xlu1 %3139 }
 0x58f   : > { %3944 = vrcp.f32 %v3140_v30 }
 0x595   : > { %v3945_v31 = vpop.eup %3944 }
 0x596   : > { %v3146_v32 = vmul.f32 %v3945_v31, %v3941_v25  ;;  %v3143_v33 = vpop.xlane.xlu1 %3142 }
 0x597   : > { %3946 = vrcp.f32 %v3143_v33 }
 0x598   : > { %3148 = vst.msk [vmem:[%s877_s15] sm:$0xff] %vm3125_vm4, %v3146_v32 }
 0x59d   : > { %v3947_v34 = vpop.eup %3946 }
 0x59e   : > { %v3147_v35 = vmul.f32 %v3947_v34, %v3943_v27 }
 0x5a0   : > { %3149 = vst.msk [vmem:[%s877_s15 + $0x8] sm:$0xff] %vm3125_vm4, %v3147_v35 }
 0x5a1 PF: > { %p16_p9 = scmp.ge.s32.totalorder %s4040_s13, 4   ;;  %s4953_s30 = smov %s3967_s10 }
 0x5a2   : > { %s4954_s10 = smov %s4049_s16  ;;  %s4955_s11 = smov %s4040_s13 }
 0x5a3   :  { %18 = sbr.rel (!%p16_p9) target bundleno = 2 (0x2), region = 139 }

</bundles_post_ra>
